<compile_context>
chip_gen: v7x
topology: tpu7x:2x2x1
jax: 0.10.0
libtpu: 0.0.40
codegen_flags: <defaults>
</compile_context>

<pallas_src>
import jax
import jax.numpy as jnp
from jax import lax
from jax.experimental import pallas as pl
from jax.experimental.pallas import tpu as pltpu

# ----- cfg (synthetic, deterministic) ------------------------------------------------
ROT_W = 1.0                # cfg.rot_loss_weight
ROT_ANGLE_T_FILTER = 0.2   # cfg.rot_angle_loss_t_filter
TRANS_W = 1.0              # cfg.trans_loss_weight
BBC_W = 0.25               # cfg.bb_coords_loss_weight
BBC_T_FILTER = 0.25        # cfg.bb_coords_loss_t_filter
BDM_W = 0.25               # cfg.bb_dist_map_loss_weight
BDM_T_FILTER = 0.25        # cfg.bb_dist_map_loss_t_filter
TOR_W = 1.0                # cfg.torsion_loss_weight
FAPE_W = 0.0               # cfg.fape_loss_weight  (== 0 -> torch takes the zeros branch)
EPS = 1e-6


def _sq3(v):
    """Sum of squares over the 3 coordinate rows of a (3, X) slab -> (1, X)."""
    return v[0:1, :] * v[0:1, :] + v[1:2, :] * v[1:2, :] + v[2:3, :] * v[2:3, :]


# ----- Pallas kernel ------------------------------------------------------------------
# bdm_flag_ref : SMEM (B_pad,) int32  -- 1 iff (t < BDM_T_FILTER) for that protein
# nslab_ref    : (BB, 56, N)  lane-dense per-residue features
#   row 0      : rigids_mask
#   rows 1:4   : gt_rot_score (x,y,z)        rows 4:7   : pred_rot_score
#   rows 7:10  : gt_trans_score              rows 10:13 : pred_trans_score
#   rows 13:27 : gt_torsion (N,7,2 -> 14)    rows 27:41 : pred_torsion (14)
#   rows 41:55 : torsion mask repeated x2    row 55     : pad
# lslab_ref    : (BB, 8, L)   lane-dense backbone-atom features (L = 4N)
#   rows 0:3 : gt backbone xyz   rows 3:6 : pred backbone xyz
#   row 6    : bb mask (already * rigids_mask)   row 7 : pad
# out_ref      : (BB, 8, 1)   per-protein raw loss scalars (sublanes 0..5)
def _make_score_loss_kernel(dist_tile):
    f32 = jnp.float32

    def kernel(bdm_flag_ref, nslab_ref, lslab_ref, out_ref):
        BB = nslab_ref.shape[0]
        L = lslab_ref.shape[2]
        blk = pl.program_id(0)

        def per_protein(i, carry):
            # ------------- per-residue features (lane axis = N residues) -------------
            nsl = nslab_ref[i]                                        # (56, N)
            mask = nsl[0:1, :]                                        # (1, N)
            mask_sum = jnp.sum(mask, keepdims=True) + EPS             # (1, 1)

            gt_rs = nsl[1:4, :]                                       # (3, N)
            pr_rs = nsl[4:7, :]
            gt_ang = jnp.sqrt(_sq3(gt_rs))                            # (1, N)
            pr_ang = jnp.sqrt(_sq3(pr_rs))
            gt_axis = gt_rs / (gt_ang + EPS)
            pr_axis = pr_rs / (pr_ang + EPS)
            rot_axis_loss = jnp.sum((gt_axis - pr_axis) ** 2 * mask,
                                    keepdims=True) / mask_sum
            rot_angle_raw = jnp.sum((gt_ang - pr_ang) ** 2 * mask,
                                    keepdims=True) / mask_sum

            gt_ts = nsl[7:10, :]
            pr_ts = nsl[10:13, :]
            trans_raw = jnp.sum((gt_ts - pr_ts) ** 2 * mask, keepdims=True) / mask_sum

            gt_tor = nsl[13:27, :]                                    # (14, N)
            pr_tor = nsl[27:41, :]
            tmask = nsl[41:55, :]
            # EPS keeps padded (all-zero-mask) proteins NaN-free.
            torsion_loss = (jnp.sum((gt_tor - pr_tor) ** 2 * tmask, keepdims=True)
                            / (0.5 * jnp.sum(tmask, keepdims=True) + EPS))

            # ------------- backbone coordinates (lane axis = L atoms) ----------------
            lsl = lslab_ref[i]                                        # (8, L)
            gt_bb = lsl[0:3, :]                                       # (3, L)
            pr_bb = lsl[3:6, :]
            bbm_row = lsl[6:7, :]                                     # (1, L)
            bbm_sum = jnp.sum(bbm_row, keepdims=True)                 # (1, 1)
            bbc_raw = (jnp.sum((gt_bb - pr_bb) ** 2 * bbm_row, keepdims=True)
                       / (bbm_sum + EPS))

            # ------------- emit the cheap per-protein scalars -------------------------
            out_ref[i, 0:1, :] = rot_axis_loss
            out_ref[i, 1:2, :] = rot_angle_raw
            out_ref[i, 2:3, :] = trans_raw
            out_ref[i, 3:4, :] = bbc_raw
            out_ref[i, 4:5, :] = jnp.zeros((1, 1), f32)   # default: dist map skipped
            out_ref[i, 5:6, :] = torsion_loss
            out_ref[i, 6:8, :] = jnp.zeros((2, 1), f32)

            # ------------- O(L^2) distance map, gated on (t < BDM_T_FILTER) ----------
            @pl.when(bdm_flag_ref[blk * BB + i] != 0)
            def _():
                lT = jnp.transpose(lsl)                               # (L, 8), one XLU op
                ng_all = _sq3(gt_bb)                                  # (1, L)  |gt_j|^2
                np_all = _sq3(pr_bb)                                  # (1, L)  |pred_j|^2
                # RHS slabs for the MXU cross-terms: -2 folded in, non-coordinate
                # channels zeroed so (T,8)x(8,W) dot yields exactly -2 * x_i . x_j.
                ch = lax.broadcasted_iota(jnp.int32, (8, 1), 0)
                rhs_gt = lsl * jnp.where(ch < 3, -2.0, 0.0)
                rhs_pr = lsl * jnp.where((ch >= 3) & (ch < 6), -2.0, 0.0)

                num_acc = jnp.zeros((1, 1), f32)
                den_acc = jnp.zeros((1, 1), f32)
                r0 = 0
                while r0 < L:                                         # static tiling
                    T = min(dist_tile, L - r0)
                    W = L - r0                                        # symmetry: cols >= r0
                    rows = lT[r0:r0 + T, :]                           # (T, 8)
                    ng_r = (rows[:, 0:1] * rows[:, 0:1] + rows[:, 1:2] * rows[:, 1:2]
                            + rows[:, 2:3] * rows[:, 2:3])            # (T, 1)
                    np_r = (rows[:, 3:4] * rows[:, 3:4] + rows[:, 4:5] * rows[:, 4:5]
                            + rows[:, 5:6] * rows[:, 5:6])
                    bbm_r = rows[:, 6:7]                              # (T, 1)
                    # MXU cross-terms (VALU stays free for the remaining elementwise).
                    cross_g = jnp.dot(rows, rhs_gt[:, r0:],
                                      preferred_element_type=f32,
                                      precision=jax.lax.Precision.HIGHEST)   # (T, W)
                    cross_p = jnp.dot(rows, rhs_pr[:, r0:],
                                      preferred_element_type=f32,
                                      precision=jax.lax.Precision.HIGHEST)
                    d2g = jnp.maximum(ng_r + ng_all[:, r0:] + cross_g, 0.0)
                    d2p = jnp.maximum(np_r + np_all[:, r0:] + cross_p, 0.0)
                    # strict upper triangle + gt-distance cutoff (d2g < 36 == gd < 6)
                    ii = lax.broadcasted_iota(jnp.int32, (T, W), 0)
                    jj = lax.broadcasted_iota(jnp.int32, (T, W), 1)
                    valid = (jj > ii) & (d2g < 36.0)
                    dm = jnp.where(valid, bbm_r * bbm_row[:, r0:], 0.0)
                    # (gd - pd)^2 = d2g + d2p - 2*sqrt(d2g*d2p): one EUP sqrt / element
                    s = jnp.sqrt(d2g * d2p)
                    num_elem = (d2g + d2p) - (s + s)
                    num_acc = num_acc + jnp.sum(num_elem * dm, keepdims=True)
                    den_acc = den_acc + jnp.sum(dm, keepdims=True)
                    r0 += T

                # symmetric completion: off-diagonal pairs counted twice; the diagonal
                # contributes 0 to the numerator and sum(bbm) to the denominator.
                bdm_num = num_acc + num_acc
                bdm_den = den_acc + den_acc + bbm_sum
                out_ref[i, 4:5, :] = bdm_num / (bdm_den + EPS)

            return carry

        lax.fori_loop(0, BB, per_protein, 0)

    return kernel


# ----- wrapper ------------------------------------------------------------------------
def base_score_network_loss(t, rigids_mask,
                            gt_rot_score, pred_rot_score, gt_rot_score_norm,
                            gt_trans_score, pred_trans_score, gt_trans_score_norm,
                            gt_bb_coords, pred_bb_coords, bb_coords_mask,
                            gt_torsion_angles, pred_torsions, torsion_angles_mask,
                            batch_block=None, dist_row_tile=None):
    f32 = jnp.float32
    B, N = rigids_mask.shape
    A = gt_bb_coords.shape[2]               # 4 backbone atoms per residue
    L = N * A

    mask = rigids_mask.astype(f32)                                           # (B, N)
    t = t.astype(f32)

    def to_lane_dense(x):                   # (B, N, C) -> (B, C, N)
        return jnp.swapaxes(x.astype(f32), 1, 2)

    # lane-dense per-residue slab (B, 56, N)
    tmask14 = jnp.repeat(torsion_angles_mask.astype(f32), 2, axis=-1)        # (B, N, 14)
    nslab = jnp.concatenate([
        mask[:, None, :],                                                    # row 0
        to_lane_dense(gt_rot_score), to_lane_dense(pred_rot_score),          # 1:4, 4:7
        to_lane_dense(gt_trans_score), to_lane_dense(pred_trans_score),      # 7:10, 10:13
        to_lane_dense(gt_torsion_angles.reshape(B, N, 14)),                  # 13:27
        to_lane_dense(pred_torsions.reshape(B, N, 14)),                      # 27:41
        to_lane_dense(tmask14),                                              # 41:55
        jnp.zeros((B, 1, N), f32),                                           # 55 (pad)
    ], axis=1)

    # lane-dense backbone slab (B, 8, L)
    bbm = (bb_coords_mask.astype(f32) * mask[..., None]).reshape(B, L)
    lslab = jnp.concatenate([
        jnp.swapaxes(gt_bb_coords.astype(f32).reshape(B, L, 3), 1, 2),       # 0:3
        jnp.swapaxes(pred_bb_coords.astype(f32).reshape(B, L, 3), 1, 2),     # 3:6
        bbm[:, None, :],                                                     # 6
        jnp.zeros((B, 1, L), f32),                                           # 7 (pad)
    ], axis=1)

    # per-protein "compute the O(L^2) distance map" flags (t filter), scalar-prefetched
    bdm_flags = (t < BDM_T_FILTER).astype(jnp.int32)                         # (B,)

    # batch blocking: small blocks (<=4) to respect v7x's 64 MiB VMEM and keep >= 2
    # grid steps whenever B >= 2 so the "parallel" batch axis feeds both TensorCores.
    if batch_block is None:
        batch_block = 1 if B < 4 else min(4, B // 2)
    BB = int(batch_block)
    G = -(-B // BB)
    B_pad = G * BB
    if B_pad != B:
        nslab = jnp.pad(nslab, ((0, B_pad - B), (0, 0), (0, 0)))
        lslab = jnp.pad(lslab, ((0, B_pad - B), (0, 0), (0, 0)))
        bdm_flags = jnp.pad(bdm_flags, (0, B_pad - B))                       # skip padded rows
    # TODO(synk): for B == 1 a second "parallel" grid axis over distance-map row tiles
    # (with a revisited accumulator) would keep v7x's second TensorCore busy.

    # distance-map row-tile: 128 rows fits comfortably in v5e's 16 MiB scoped VMEM
    # for L <= 2048; drop to 64 for very long chains.
    if dist_row_tile is None:
        dist_row_tile = 128 if L <= 2048 else 64

    grid_spec = pltpu.PrefetchScalarGridSpec(
        num_scalar_prefetch=1,
        grid=(G,),
        in_specs=[pl.BlockSpec((BB, 56, N), lambda b, flags: (b, 0, 0)),
                  pl.BlockSpec((BB, 8, L), lambda b, flags: (b, 0, 0))],
        out_specs=pl.BlockSpec((BB, 8, 1), lambda b, flags: (b, 0, 0)),
    )
    raw = pl.pallas_call(
        _make_score_loss_kernel(dist_row_tile),
        out_shape=jax.ShapeDtypeStruct((B_pad, 8, 1), f32),
        grid_spec=grid_spec,
        compiler_params=pltpu.CompilerParams(dimension_semantics=("parallel",)),
    )(bdm_flags, nslab, lslab)

    raw = raw[:B, :, 0]                                                      # (B, 8)
    rot_axis_loss = raw[:, 0]
    rot_angle_raw = raw[:, 1]
    trans_raw = raw[:, 2]
    bbc_raw = raw[:, 3]
    bdm_raw = raw[:, 4]
    torsion_loss = raw[:, 5]

    # per-batch scalar normalization + t-filters (glue; commutes with the masked sums)
    rot_angle_loss = rot_angle_raw / gt_rot_score_norm.astype(f32) ** 2
    rot_angle_loss = rot_angle_loss * (t > ROT_ANGLE_T_FILTER).astype(f32)
    rot_loss = rot_axis_loss + rot_angle_loss
    trans_loss = trans_raw / gt_trans_score_norm.astype(f32) ** 2
    bb_coords_loss = bbc_raw * (t < BBC_T_FILTER).astype(f32)
    bb_dist_map_loss = bdm_raw * (t < BDM_T_FILTER).astype(f32)
    fape_loss = jnp.zeros_like(trans_loss)          # fape_loss_weight == 0 branch

    total = (ROT_W * rot_loss + TRANS_W * trans_loss + BBC_W * bb_coords_loss
             + BDM_W * bb_dist_map_loss + TOR_W * torsion_loss + FAPE_W * fape_loss)
    loss = total.mean()
    # device scalars (no blocking host syncs here)
    aux_info = {
        'total': loss,
        'rot': rot_loss.mean(),
        'trans': trans_loss.mean(),
        'bb_coords': bb_coords_loss.mean(),
        'bb_dist_map': bb_dist_map_loss.mean(),
        'torsion': torsion_loss.mean(),
        'fape': fape_loss.mean(),
    }
    return loss, aux_info


# ----- pure-JAX reference (mirrors the torch loss_fn) for a correctness check --------
def _reference_loss(t, rigids_mask,
                    gt_rot_score, pred_rot_score, gt_rot_score_norm,
                    gt_trans_score, pred_trans_score, gt_trans_score_norm,
                    gt_bb_coords, pred_bb_coords, bb_coords_mask,
                    gt_torsion_angles, pred_torsions, torsion_angles_mask):
    bb_coords_mask = bb_coords_mask * rigids_mask[..., None]
    msum = rigids_mask.sum(-1) + EPS
    gt_ang = jnp.linalg.norm(gt_rot_score, axis=-1, keepdims=True)
    pr_ang = jnp.linalg.norm(pred_rot_score, axis=-1, keepdims=True)
    gt_axis = gt_rot_score / (gt_ang + EPS)
    pr_axis = pred_rot_score / (pr_ang + EPS)
    rot_axis = ((gt_axis - pr_axis) ** 2 * rigids_mask[..., None]).sum((-2, -1)) / msum
    rot_angle = (((gt_ang - pr_ang) ** 2 * rigids_mask[..., None])
                 / gt_rot_score_norm[:, None, None] ** 2).sum((-2, -1)) / msum
    rot_angle = rot_angle * (t > ROT_ANGLE_T_FILTER)
    rot_loss = rot_axis + rot_angle
    trans_loss = (((gt_trans_score - pred_trans_score) ** 2 * rigids_mask[..., None])
                  / gt_trans_score_norm[:, None, None] ** 2).sum((-2, -1)) / msum
    bbc = ((gt_bb_coords - pred_bb_coords) ** 2 * bb_coords_mask[..., None]).sum((-3, -2, -1))
    bbc = bbc / (bb_coords_mask.sum((-2, -1)) + EPS) * (t < BBC_T_FILTER)
    B = gt_bb_coords.shape[0]
    gt_f = gt_bb_coords.reshape(B, -1, 3)
    pr_f = pred_bb_coords.reshape(B, -1, 3)
    gt_d = jnp.sqrt(((gt_f[:, :, None, :] - gt_f[:, None, :, :]) ** 2).sum(-1))
    pr_d = jnp.sqrt(((pr_f[:, :, None, :] - pr_f[:, None, :, :]) ** 2).sum(-1))
    bmf = bb_coords_mask.reshape(B, -1)
    dmask = bmf[:, None, :] * bmf[:, :, None] * (gt_d < 6.0)
    bdm = ((gt_d - pr_d) ** 2 * dmask).sum((-2, -1)) / (dmask.sum((-2, -1)) + EPS)
    bdm = bdm * (t < BDM_T_FILTER)
    tor = ((gt_torsion_angles - pred_torsions) ** 2
           * torsion_angles_mask[..., None]).sum((-1, -2, -3)) / torsion_angles_mask.sum((-1, -2))
    fape = jnp.zeros_like(trans_loss)
    total = (ROT_W * rot_loss + TRANS_W * trans_loss + BBC_W * bbc
             + BDM_W * bdm + TOR_W * tor + FAPE_W * fape)
    return total.mean()


if __name__ == "__main__":
    B, N = 2, 32
    key = jax.random.PRNGKey(0)
    ks = jax.random.split(key, 12)

    aatype = jax.random.randint(ks[0], (B, N), 0, 20)            # unused (see TODO above)
    t = jnp.array([0.1, 0.6], dtype=jnp.float32)
    padding_mask = jnp.ones((B, N), jnp.float32).at[1, -3:].set(0.0)
    rigids_mask = jnp.ones((B, N), jnp.float32) * padding_mask   # forward: rigids_mask * padding_mask

    gt_rot_score = jax.random.normal(ks[1], (B, N, 3), jnp.float32)
    gt_rot_score_norm = jax.random.uniform(ks[2], (B,), jnp.float32, 0.5, 1.5)
    gt_trans_score = jax.random.normal(ks[3], (B, N, 3), jnp.float32)
    gt_trans_score_norm = jax.random.uniform(ks[4], (B,), jnp.float32, 0.5, 1.5)
    gt_bb_coords = jax.random.normal(ks[5], (B, N, 4, 3), jnp.float32) * 2.0
    bb_coords_mask = jnp.ones((B, N, 4), jnp.float32).at[0, 0, 3].set(0.0)
    gt_torsion_angles = jax.random.normal(ks[6], (B, N, 7, 2), jnp.float32)
    torsion_angles_mask = jnp.ones((B, N, 7), jnp.float32).at[:, :, 5:].set(0.0)

    # TODO(synk): model_nn / diffuser.calc_*_score are external modules; their outputs
    # (pre-masked scores, atom14, torsions) are synthesized deterministically here.
    pred_atom14 = jax.random.normal(ks[7], (B, N, 14, 3), jnp.float32) * 2.0
    pred_torsions = jax.random.normal(ks[8], (B, N, 7, 2), jnp.float32)
    pred_rot_score = jax.random.normal(ks[9], (B, N, 3), jnp.float32) * rigids_mask[..., None]
    pred_trans_score = jax.random.normal(ks[10], (B, N, 3), jnp.float32) * rigids_mask[..., None]
    # TODO(synk): atom14_to_atom37 uses residue-constant gather tables; for standard
    # residues backbone atoms N,CA,C,O are atom14 slots [0,1,2,3] == atom37 slots [0,1,2,4].
    pred_bb_coords = pred_atom14[:, :, :4, :]

    loss, aux = base_score_network_loss(
        t, rigids_mask,
        gt_rot_score, pred_rot_score, gt_rot_score_norm,
        gt_trans_score, pred_trans_score, gt_trans_score_norm,
        gt_bb_coords, pred_bb_coords, bb_coords_mask,
        gt_torsion_angles, pred_torsions, torsion_angles_mask)
    loss = jax.block_until_ready(loss)

    ref = float(_reference_loss(
        t, rigids_mask,
        gt_rot_score, pred_rot_score, gt_rot_score_norm,
        gt_trans_score, pred_trans_score, gt_trans_score_norm,
        gt_bb_coords, pred_bb_coords, bb_coords_mask,
        gt_torsion_angles, pred_torsions, torsion_angles_mask))
    assert abs(float(loss) - ref) <= 1e-4 * max(1.0, abs(ref)), (float(loss), ref)

    print("KERNEL_OK")
</pallas_src>

<mosaic_0001>
module attributes {stable_mosaic.version = 11 : i64} {
  func.func @kernel(%arg0: i32, %arg1: memref<2xi32, #tpu.memory_space<smem>>, %arg2: memref<1x56x32xf32, #tpu.memory_space<vmem>>, %arg3: memref<1x8x128xf32, #tpu.memory_space<vmem>>, %arg4: memref<1x8x1xf32, #tpu.memory_space<vmem>>) attributes {dimension_semantics = [#tpu.dimension_semantics<parallel>], iteration_bounds = array<i64: 2>, scalar_prefetch = 1 : i64, scratch_operands = 0 : i64, tpu.core_type = #tpu.core_type<tc>, window_params = [{transform_indices = @transform_0, window_bounds = array<i64: 1, 56, 32>}, {transform_indices = @transform_1, window_bounds = array<i64: 1, 8, 128>}, {transform_indices = @transform_2, window_bounds = array<i64: 1, 8, 1>}]} {
    %c0_i32 = arith.constant 0 : i32
    %0 = arith.index_cast %c0_i32 : i32 to index
    %c0 = arith.constant 0 : index
    %c0_0 = arith.constant 0 : index
    %1 = vector.load %arg2[%0, %c0, %c0_0] : memref<1x56x32xf32, #tpu.memory_space<vmem>>, vector<1x56x32xf32>
    %2 = vector.shape_cast %1 : vector<1x56x32xf32> to vector<56x32xf32>
    %3 = vector.extract_strided_slice %2 {offsets = [0, 0], sizes = [1, 32], strides = [1, 1]} : vector<56x32xf32> to vector<1x32xf32>
    %4 = vector.shape_cast %3 : vector<1x32xf32> to vector<1x1x32xf32>
    %cst = arith.constant dense<0.000000e+00> : vector<1xf32>
    %5 = vector.multi_reduction <add>, %4, %cst [1, 2] : vector<1x1x32xf32> to vector<1xf32>
    %6 = vector.shape_cast %5 : vector<1xf32> to vector<1x1x1xf32>
    %7 = vector.extract %6[0, 0, 0] : f32 from vector<1x1x1xf32>
    %8 = vector.broadcast %7 : f32 to vector<1x1xf32>
    %cst_1 = arith.constant 9.99999997E-7 : f32
    %9 = vector.broadcast %cst_1 : f32 to vector<1x1xf32>
    %10 = arith.addf %8, %9 : vector<1x1xf32>
    %11 = vector.extract_strided_slice %2 {offsets = [1, 0], sizes = [3, 32], strides = [1, 1]} : vector<56x32xf32> to vector<3x32xf32>
    %12 = vector.extract_strided_slice %2 {offsets = [4, 0], sizes = [3, 32], strides = [1, 1]} : vector<56x32xf32> to vector<3x32xf32>
    %13 = vector.extract_strided_slice %11 {offsets = [0, 0], sizes = [1, 32], strides = [1, 1]} : vector<3x32xf32> to vector<1x32xf32>
    %14 = vector.extract_strided_slice %11 {offsets = [0, 0], sizes = [1, 32], strides = [1, 1]} : vector<3x32xf32> to vector<1x32xf32>
    %15 = arith.mulf %13, %14 : vector<1x32xf32>
    %16 = vector.extract_strided_slice %11 {offsets = [1, 0], sizes = [1, 32], strides = [1, 1]} : vector<3x32xf32> to vector<1x32xf32>
    %17 = vector.extract_strided_slice %11 {offsets = [1, 0], sizes = [1, 32], strides = [1, 1]} : vector<3x32xf32> to vector<1x32xf32>
    %18 = arith.mulf %16, %17 : vector<1x32xf32>
    %19 = arith.addf %15, %18 : vector<1x32xf32>
    %20 = vector.extract_strided_slice %11 {offsets = [2, 0], sizes = [1, 32], strides = [1, 1]} : vector<3x32xf32> to vector<1x32xf32>
    %21 = vector.extract_strided_slice %11 {offsets = [2, 0], sizes = [1, 32], strides = [1, 1]} : vector<3x32xf32> to vector<1x32xf32>
    %22 = arith.mulf %20, %21 : vector<1x32xf32>
    %23 = arith.addf %19, %22 : vector<1x32xf32>
    %24 = math.sqrt %23 : vector<1x32xf32>
    %25 = vector.extract_strided_slice %12 {offsets = [0, 0], sizes = [1, 32], strides = [1, 1]} : vector<3x32xf32> to vector<1x32xf32>
    %26 = vector.extract_strided_slice %12 {offsets = [0, 0], sizes = [1, 32], strides = [1, 1]} : vector<3x32xf32> to vector<1x32xf32>
    %27 = arith.mulf %25, %26 : vector<1x32xf32>
    %28 = vector.extract_strided_slice %12 {offsets = [1, 0], sizes = [1, 32], strides = [1, 1]} : vector<3x32xf32> to vector<1x32xf32>
    %29 = vector.extract_strided_slice %12 {offsets = [1, 0], sizes = [1, 32], strides = [1, 1]} : vector<3x32xf32> to vector<1x32xf32>
    %30 = arith.mulf %28, %29 : vector<1x32xf32>
    %31 = arith.addf %27, %30 : vector<1x32xf32>
    %32 = vector.extract_strided_slice %12 {offsets = [2, 0], sizes = [1, 32], strides = [1, 1]} : vector<3x32xf32> to vector<1x32xf32>
    %33 = vector.extract_strided_slice %12 {offsets = [2, 0], sizes = [1, 32], strides = [1, 1]} : vector<3x32xf32> to vector<1x32xf32>
    %34 = arith.mulf %32, %33 : vector<1x32xf32>
    %35 = arith.addf %31, %34 : vector<1x32xf32>
    %36 = math.sqrt %35 : vector<1x32xf32>
    %cst_2 = arith.constant 9.99999997E-7 : f32
    %37 = vector.broadcast %cst_2 : f32 to vector<1x32xf32>
    %38 = arith.addf %24, %37 : vector<1x32xf32>
    %39 = vector.broadcast %38 : vector<1x32xf32> to vector<3x32xf32>
    %40 = arith.divf %11, %39 : vector<3x32xf32>
    %cst_3 = arith.constant 9.99999997E-7 : f32
    %41 = vector.broadcast %cst_3 : f32 to vector<1x32xf32>
    %42 = arith.addf %36, %41 : vector<1x32xf32>
    %43 = vector.broadcast %42 : vector<1x32xf32> to vector<3x32xf32>
    %44 = arith.divf %12, %43 : vector<3x32xf32>
    %45 = arith.subf %40, %44 : vector<3x32xf32>
    %46 = arith.mulf %45, %45 : vector<3x32xf32>
    %47 = vector.broadcast %3 : vector<1x32xf32> to vector<3x32xf32>
    %48 = arith.mulf %46, %47 : vector<3x32xf32>
    %49 = vector.shape_cast %48 : vector<3x32xf32> to vector<1x3x32xf32>
    %cst_4 = arith.constant dense<0.000000e+00> : vector<1xf32>
    %50 = vector.multi_reduction <add>, %49, %cst_4 [1, 2] : vector<1x3x32xf32> to vector<1xf32>
    %51 = vector.shape_cast %50 : vector<1xf32> to vector<1x1x1xf32>
    %52 = vector.extract %51[0, 0, 0] : f32 from vector<1x1x1xf32>
    %53 = vector.broadcast %52 : f32 to vector<1x1xf32>
    %54 = arith.divf %53, %10 : vector<1x1xf32>
    %55 = arith.subf %24, %36 : vector<1x32xf32>
    %56 = arith.mulf %55, %55 : vector<1x32xf32>
    %57 = arith.mulf %56, %3 : vector<1x32xf32>
    %58 = vector.shape_cast %57 : vector<1x32xf32> to vector<1x1x32xf32>
    %cst_5 = arith.constant dense<0.000000e+00> : vector<1xf32>
    %59 = vector.multi_reduction <add>, %58, %cst_5 [1, 2] : vector<1x1x32xf32> to vector<1xf32>
    %60 = vector.shape_cast %59 : vector<1xf32> to vector<1x1x1xf32>
    %61 = vector.extract %60[0, 0, 0] : f32 from vector<1x1x1xf32>
    %62 = vector.broadcast %61 : f32 to vector<1x1xf32>
    %63 = arith.divf %62, %10 : vector<1x1xf32>
    %64 = vector.extract_strided_slice %2 {offsets = [7, 0], sizes = [3, 32], strides = [1, 1]} : vector<56x32xf32> to vector<3x32xf32>
    %65 = vector.extract_strided_slice %2 {offsets = [10, 0], sizes = [3, 32], strides = [1, 1]} : vector<56x32xf32> to vector<3x32xf32>
    %66 = arith.subf %64, %65 : vector<3x32xf32>
    %67 = arith.mulf %66, %66 : vector<3x32xf32>
    %68 = vector.broadcast %3 : vector<1x32xf32> to vector<3x32xf32>
    %69 = arith.mulf %67, %68 : vector<3x32xf32>
    %70 = vector.shape_cast %69 : vector<3x32xf32> to vector<1x3x32xf32>
    %cst_6 = arith.constant dense<0.000000e+00> : vector<1xf32>
    %71 = vector.multi_reduction <add>, %70, %cst_6 [1, 2] : vector<1x3x32xf32> to vector<1xf32>
    %72 = vector.shape_cast %71 : vector<1xf32> to vector<1x1x1xf32>
    %73 = vector.extract %72[0, 0, 0] : f32 from vector<1x1x1xf32>
    %74 = vector.broadcast %73 : f32 to vector<1x1xf32>
    %75 = arith.divf %74, %10 : vector<1x1xf32>
    %76 = vector.extract_strided_slice %2 {offsets = [13, 0], sizes = [14, 32], strides = [1, 1]} : vector<56x32xf32> to vector<14x32xf32>
    %77 = vector.extract_strided_slice %2 {offsets = [27, 0], sizes = [14, 32], strides = [1, 1]} : vector<56x32xf32> to vector<14x32xf32>
    %78 = vector.extract_strided_slice %2 {offsets = [41, 0], sizes = [14, 32], strides = [1, 1]} : vector<56x32xf32> to vector<14x32xf32>
    %79 = arith.subf %76, %77 : vector<14x32xf32>
    %80 = arith.mulf %79, %79 : vector<14x32xf32>
    %81 = arith.mulf %80, %78 : vector<14x32xf32>
    %82 = vector.shape_cast %81 : vector<14x32xf32> to vector<1x14x32xf32>
    %cst_7 = arith.constant dense<0.000000e+00> : vector<1xf32>
    %83 = vector.multi_reduction <add>, %82, %cst_7 [1, 2] : vector<1x14x32xf32> to vector<1xf32>
    %84 = vector.shape_cast %83 : vector<1xf32> to vector<1x1x1xf32>
    %85 = vector.extract %84[0, 0, 0] : f32 from vector<1x1x1xf32>
    %86 = vector.broadcast %85 : f32 to vector<1x1xf32>
    %87 = vector.shape_cast %78 : vector<14x32xf32> to vector<1x14x32xf32>
    %cst_8 = arith.constant dense<0.000000e+00> : vector<1xf32>
    %88 = vector.multi_reduction <add>, %87, %cst_8 [1, 2] : vector<1x14x32xf32> to vector<1xf32>
    %89 = vector.shape_cast %88 : vector<1xf32> to vector<1x1x1xf32>
    %90 = vector.extract %89[0, 0, 0] : f32 from vector<1x1x1xf32>
    %91 = vector.broadcast %90 : f32 to vector<1x1xf32>
    %cst_9 = arith.constant 5.000000e-01 : f32
    %92 = vector.broadcast %cst_9 : f32 to vector<1x1xf32>
    %93 = arith.mulf %92, %91 : vector<1x1xf32>
    %cst_10 = arith.constant 9.99999997E-7 : f32
    %94 = vector.broadcast %cst_10 : f32 to vector<1x1xf32>
    %95 = arith.addf %93, %94 : vector<1x1xf32>
    %96 = arith.divf %86, %95 : vector<1x1xf32>
    %97 = arith.index_cast %c0_i32 : i32 to index
    %c0_11 = arith.constant 0 : index
    %c0_12 = arith.constant 0 : index
    %98 = vector.load %arg3[%97, %c0_11, %c0_12] : memref<1x8x128xf32, #tpu.memory_space<vmem>>, vector<1x8x128xf32>
    %99 = vector.shape_cast %98 : vector<1x8x128xf32> to vector<8x128xf32>
    %100 = vector.extract_strided_slice %99 {offsets = [0, 0], sizes = [3, 128], strides = [1, 1]} : vector<8x128xf32> to vector<3x128xf32>
    %101 = vector.extract_strided_slice %99 {offsets = [3, 0], sizes = [3, 128], strides = [1, 1]} : vector<8x128xf32> to vector<3x128xf32>
    %102 = vector.extract_strided_slice %99 {offsets = [6, 0], sizes = [1, 128], strides = [1, 1]} : vector<8x128xf32> to vector<1x128xf32>
    %103 = vector.shape_cast %102 : vector<1x128xf32> to vector<1x1x128xf32>
    %cst_13 = arith.constant dense<0.000000e+00> : vector<1xf32>
    %104 = vector.multi_reduction <add>, %103, %cst_13 [1, 2] : vector<1x1x128xf32> to vector<1xf32>
    %105 = vector.shape_cast %104 : vector<1xf32> to vector<1x1x1xf32>
    %106 = vector.extract %105[0, 0, 0] : f32 from vector<1x1x1xf32>
    %107 = vector.broadcast %106 : f32 to vector<1x1xf32>
    %108 = arith.subf %100, %101 : vector<3x128xf32>
    %109 = arith.mulf %108, %108 : vector<3x128xf32>
    %110 = vector.broadcast %102 : vector<1x128xf32> to vector<3x128xf32>
    %111 = arith.mulf %109, %110 : vector<3x128xf32>
    %112 = vector.shape_cast %111 : vector<3x128xf32> to vector<1x3x128xf32>
    %cst_14 = arith.constant dense<0.000000e+00> : vector<1xf32>
    %113 = vector.multi_reduction <add>, %112, %cst_14 [1, 2] : vector<1x3x128xf32> to vector<1xf32>
    %114 = vector.shape_cast %113 : vector<1xf32> to vector<1x1x1xf32>
    %115 = vector.extract %114[0, 0, 0] : f32 from vector<1x1x1xf32>
    %116 = vector.broadcast %115 : f32 to vector<1x1xf32>
    %cst_15 = arith.constant 9.99999997E-7 : f32
    %117 = vector.broadcast %cst_15 : f32 to vector<1x1xf32>
    %118 = arith.addf %107, %117 : vector<1x1xf32>
    %119 = arith.divf %116, %118 : vector<1x1xf32>
    %120 = arith.index_cast %c0_i32 : i32 to index
    %c0_16 = arith.constant 0 : index
    %c0_17 = arith.constant 0 : index
    %121 = vector.load %arg4[%120, %c0_16, %c0_17] : memref<1x8x1xf32, #tpu.memory_space<vmem>>, vector<1x1x1xf32>
    %122 = vector.shape_cast %121 : vector<1x1x1xf32> to vector<1x1xf32>
    %123 = vector.shape_cast %54 : vector<1x1xf32> to vector<1x1x1xf32>
    tpu.vector_store %arg4[%120, %c0_16, %c0_17], %123 {strides = array<i32>} : memref<1x8x1xf32, #tpu.memory_space<vmem>>, vector<1x1x1xf32>,
    %124 = arith.index_cast %c0_i32 : i32 to index
    %c1 = arith.constant 1 : index
    %c0_18 = arith.constant 0 : index
    %125 = vector.load %arg4[%124, %c1, %c0_18] : memref<1x8x1xf32, #tpu.memory_space<vmem>>, vector<1x1x1xf32>
    %126 = vector.shape_cast %125 : vector<1x1x1xf32> to vector<1x1xf32>
    %127 = vector.shape_cast %63 : vector<1x1xf32> to vector<1x1x1xf32>
    tpu.vector_store %arg4[%124, %c1, %c0_18], %127 {strides = array<i32>} : memref<1x8x1xf32, #tpu.memory_space<vmem>>, vector<1x1x1xf32>,
    %128 = arith.index_cast %c0_i32 : i32 to index
    %c2 = arith.constant 2 : index
    %c0_19 = arith.constant 0 : index
    %129 = vector.load %arg4[%128, %c2, %c0_19] : memref<1x8x1xf32, #tpu.memory_space<vmem>>, vector<1x1x1xf32>
    %130 = vector.shape_cast %129 : vector<1x1x1xf32> to vector<1x1xf32>
    %131 = vector.shape_cast %75 : vector<1x1xf32> to vector<1x1x1xf32>
    tpu.vector_store %arg4[%128, %c2, %c0_19], %131 {strides = array<i32>} : memref<1x8x1xf32, #tpu.memory_space<vmem>>, vector<1x1x1xf32>,
    %132 = arith.index_cast %c0_i32 : i32 to index
    %c3 = arith.constant 3 : index
    %c0_20 = arith.constant 0 : index
    %133 = vector.load %arg4[%132, %c3, %c0_20] : memref<1x8x1xf32, #tpu.memory_space<vmem>>, vector<1x1x1xf32>
    %134 = vector.shape_cast %133 : vector<1x1x1xf32> to vector<1x1xf32>
    %135 = vector.shape_cast %119 : vector<1x1xf32> to vector<1x1x1xf32>
    tpu.vector_store %arg4[%132, %c3, %c0_20], %135 {strides = array<i32>} : memref<1x8x1xf32, #tpu.memory_space<vmem>>, vector<1x1x1xf32>,
    %cst_21 = arith.constant 0.000000e+00 : f32
    %136 = vector.broadcast %cst_21 : f32 to vector<1x1xf32>
    %137 = arith.index_cast %c0_i32 : i32 to index
    %c4 = arith.constant 4 : index
    %c0_22 = arith.constant 0 : index
    %138 = vector.load %arg4[%137, %c4, %c0_22] : memref<1x8x1xf32, #tpu.memory_space<vmem>>, vector<1x1x1xf32>
    %139 = vector.shape_cast %138 : vector<1x1x1xf32> to vector<1x1xf32>
    %140 = vector.shape_cast %136 : vector<1x1xf32> to vector<1x1x1xf32>
    tpu.vector_store %arg4[%137, %c4, %c0_22], %140 {strides = array<i32>} : memref<1x8x1xf32, #tpu.memory_space<vmem>>, vector<1x1x1xf32>,
    %141 = arith.index_cast %c0_i32 : i32 to index
    %c5 = arith.constant 5 : index
    %c0_23 = arith.constant 0 : index
    %142 = vector.load %arg4[%141, %c5, %c0_23] : memref<1x8x1xf32, #tpu.memory_space<vmem>>, vector<1x1x1xf32>
    %143 = vector.shape_cast %142 : vector<1x1x1xf32> to vector<1x1xf32>
    %144 = vector.shape_cast %96 : vector<1x1xf32> to vector<1x1x1xf32>
    tpu.vector_store %arg4[%141, %c5, %c0_23], %144 {strides = array<i32>} : memref<1x8x1xf32, #tpu.memory_space<vmem>>, vector<1x1x1xf32>,
    %cst_24 = arith.constant 0.000000e+00 : f32
    %145 = vector.broadcast %cst_24 : f32 to vector<2x1xf32>
    %146 = arith.index_cast %c0_i32 : i32 to index
    %c6 = arith.constant 6 : index
    %c0_25 = arith.constant 0 : index
    %147 = vector.load %arg4[%146, %c6, %c0_25] : memref<1x8x1xf32, #tpu.memory_space<vmem>>, vector<1x2x1xf32>
    %148 = vector.shape_cast %147 : vector<1x2x1xf32> to vector<2x1xf32>
    %149 = vector.shape_cast %145 : vector<2x1xf32> to vector<1x2x1xf32>
    tpu.vector_store %arg4[%146, %c6, %c0_25], %149 {strides = array<i32>} : memref<1x8x1xf32, #tpu.memory_space<vmem>>, vector<1x2x1xf32>,
    %c1_i32 = arith.constant 1 : i32
    %150 = arith.muli %arg0, %c1_i32 : i32
    %151 = arith.addi %150, %c0_i32 : i32
    %152 = arith.index_cast %151 : i32 to index
    %153 = memref.load %arg1[%152] : memref<2xi32, #tpu.memory_space<smem>>
    %c0_i32_26 = arith.constant 0 : i32
    %154 = arith.cmpi ne, %153, %c0_i32_26 : i32
    %155 = arith.extui %154 : i1 to i32
    %c0_i32_27 = arith.constant 0 : i32
    %156 = arith.cmpi ne, %155, %c0_i32_27 : i32
    scf.if %156 {
      %157 = tpu.transpose %99, [1, 0] : vector<8x128xf32> -> vector<128x8xf32>
      %158 = vector.extract_strided_slice %100 {offsets = [0, 0], sizes = [1, 128], strides = [1, 1]} : vector<3x128xf32> to vector<1x128xf32>
      %159 = vector.extract_strided_slice %100 {offsets = [0, 0], sizes = [1, 128], strides = [1, 1]} : vector<3x128xf32> to vector<1x128xf32>
      %160 = arith.mulf %158, %159 : vector<1x128xf32>
      %161 = vector.extract_strided_slice %100 {offsets = [1, 0], sizes = [1, 128], strides = [1, 1]} : vector<3x128xf32> to vector<1x128xf32>
      %162 = vector.extract_strided_slice %100 {offsets = [1, 0], sizes = [1, 128], strides = [1, 1]} : vector<3x128xf32> to vector<1x128xf32>
      %163 = arith.mulf %161, %162 : vector<1x128xf32>
      %164 = arith.addf %160, %163 : vector<1x128xf32>
      %165 = vector.extract_strided_slice %100 {offsets = [2, 0], sizes = [1, 128], strides = [1, 1]} : vector<3x128xf32> to vector<1x128xf32>
      %166 = vector.extract_strided_slice %100 {offsets = [2, 0], sizes = [1, 128], strides = [1, 1]} : vector<3x128xf32> to vector<1x128xf32>
      %167 = arith.mulf %165, %166 : vector<1x128xf32>
      %168 = arith.addf %164, %167 : vector<1x128xf32>
      %169 = vector.extract_strided_slice %101 {offsets = [0, 0], sizes = [1, 128], strides = [1, 1]} : vector<3x128xf32> to vector<1x128xf32>
      %170 = vector.extract_strided_slice %101 {offsets = [0, 0], sizes = [1, 128], strides = [1, 1]} : vector<3x128xf32> to vector<1x128xf32>
      %171 = arith.mulf %169, %170 : vector<1x128xf32>
      %172 = vector.extract_strided_slice %101 {offsets = [1, 0], sizes = [1, 128], strides = [1, 1]} : vector<3x128xf32> to vector<1x128xf32>
      %173 = vector.extract_strided_slice %101 {offsets = [1, 0], sizes = [1, 128], strides = [1, 1]} : vector<3x128xf32> to vector<1x128xf32>
      %174 = arith.mulf %172, %173 : vector<1x128xf32>
      %175 = arith.addf %171, %174 : vector<1x128xf32>
      %176 = vector.extract_strided_slice %101 {offsets = [2, 0], sizes = [1, 128], strides = [1, 1]} : vector<3x128xf32> to vector<1x128xf32>
      %177 = vector.extract_strided_slice %101 {offsets = [2, 0], sizes = [1, 128], strides = [1, 1]} : vector<3x128xf32> to vector<1x128xf32>
      %178 = arith.mulf %176, %177 : vector<1x128xf32>
      %179 = arith.addf %175, %178 : vector<1x128xf32>
      %180 = tpu.iota {dimensions = array<i32: 0>} : vector<8x1xi32>
      %c3_i32 = arith.constant 3 : i32
      %181 = vector.broadcast %c3_i32 : i32 to vector<8x1xi32>
      %182 = arith.cmpi slt, %180, %181 : vector<8x1xi32>
      %cst_29 = arith.constant -2.000000e+00 : f32
      %cst_30 = arith.constant 0.000000e+00 : f32
      %183 = vector.broadcast %cst_29 : f32 to vector<8x1xf32>
      %184 = vector.broadcast %cst_30 : f32 to vector<8x1xf32>
      %185 = arith.select %182, %183, %184 : vector<8x1xi1>, vector<8x1xf32>
      %186 = vector.broadcast %185 : vector<8x1xf32> to vector<8x128xf32>
      %187 = arith.mulf %99, %186 : vector<8x128xf32>
      %c3_i32_31 = arith.constant 3 : i32
      %188 = vector.broadcast %c3_i32_31 : i32 to vector<8x1xi32>
      %189 = arith.cmpi sge, %180, %188 : vector<8x1xi32>
      %c6_i32 = arith.constant 6 : i32
      %190 = vector.broadcast %c6_i32 : i32 to vector<8x1xi32>
      %191 = arith.cmpi slt, %180, %190 : vector<8x1xi32>
      %192 = arith.andi %189, %191 : vector<8x1xi1>
      %cst_32 = arith.constant -2.000000e+00 : f32
      %cst_33 = arith.constant 0.000000e+00 : f32
      %193 = vector.broadcast %cst_32 : f32 to vector<8x1xf32>
      %194 = vector.broadcast %cst_33 : f32 to vector<8x1xf32>
      %195 = arith.select %192, %193, %194 : vector<8x1xi1>, vector<8x1xf32>
      %196 = vector.broadcast %195 : vector<8x1xf32> to vector<8x128xf32>
      %197 = arith.mulf %99, %196 : vector<8x128xf32>
      %cst_34 = arith.constant 0.000000e+00 : f32
      %198 = vector.broadcast %cst_34 : f32 to vector<1x1xf32>
      %cst_35 = arith.constant 0.000000e+00 : f32
      %199 = vector.broadcast %cst_35 : f32 to vector<1x1xf32>
      %200 = vector.extract_strided_slice %157 {offsets = [0, 0], sizes = [128, 1], strides = [1, 1]} : vector<128x8xf32> to vector<128x1xf32>
      %201 = vector.extract_strided_slice %157 {offsets = [0, 0], sizes = [128, 1], strides = [1, 1]} : vector<128x8xf32> to vector<128x1xf32>
      %202 = arith.mulf %200, %201 : vector<128x1xf32>
      %203 = vector.extract_strided_slice %157 {offsets = [0, 1], sizes = [128, 1], strides = [1, 1]} : vector<128x8xf32> to vector<128x1xf32>
      %204 = vector.extract_strided_slice %157 {offsets = [0, 1], sizes = [128, 1], strides = [1, 1]} : vector<128x8xf32> to vector<128x1xf32>
      %205 = arith.mulf %203, %204 : vector<128x1xf32>
      %206 = arith.addf %202, %205 : vector<128x1xf32>
      %207 = vector.extract_strided_slice %157 {offsets = [0, 2], sizes = [128, 1], strides = [1, 1]} : vector<128x8xf32> to vector<128x1xf32>
      %208 = vector.extract_strided_slice %157 {offsets = [0, 2], sizes = [128, 1], strides = [1, 1]} : vector<128x8xf32> to vector<128x1xf32>
      %209 = arith.mulf %207, %208 : vector<128x1xf32>
      %210 = arith.addf %206, %209 : vector<128x1xf32>
      %211 = vector.extract_strided_slice %157 {offsets = [0, 3], sizes = [128, 1], strides = [1, 1]} : vector<128x8xf32> to vector<128x1xf32>
      %212 = vector.extract_strided_slice %157 {offsets = [0, 3], sizes = [128, 1], strides = [1, 1]} : vector<128x8xf32> to vector<128x1xf32>
      %213 = arith.mulf %211, %212 : vector<128x1xf32>
      %214 = vector.extract_strided_slice %157 {offsets = [0, 4], sizes = [128, 1], strides = [1, 1]} : vector<128x8xf32> to vector<128x1xf32>
      %215 = vector.extract_strided_slice %157 {offsets = [0, 4], sizes = [128, 1], strides = [1, 1]} : vector<128x8xf32> to vector<128x1xf32>
      %216 = arith.mulf %214, %215 : vector<128x1xf32>
      %217 = arith.addf %213, %216 : vector<128x1xf32>
      %218 = vector.extract_strided_slice %157 {offsets = [0, 5], sizes = [128, 1], strides = [1, 1]} : vector<128x8xf32> to vector<128x1xf32>
      %219 = vector.extract_strided_slice %157 {offsets = [0, 5], sizes = [128, 1], strides = [1, 1]} : vector<128x8xf32> to vector<128x1xf32>
      %220 = arith.mulf %218, %219 : vector<128x1xf32>
      %221 = arith.addf %217, %220 : vector<128x1xf32>
      %222 = vector.extract_strided_slice %157 {offsets = [0, 6], sizes = [128, 1], strides = [1, 1]} : vector<128x8xf32> to vector<128x1xf32>
      %cst_36 = arith.constant dense<0.000000e+00> : vector<128x128xf32>
      %223 = tpu.matmul %157, %187, %cst_36 {dimension_numbers = #tpu.dot_dimension_numbers<[1], [0], [0], [1], [0, 0, 1, 1], [], []>, precision = #tpu.contract_precision<fp32>} : vector<128x8xf32>, vector<8x128xf32>, vector<128x128xf32> -> vector<128x128xf32>
      %cst_37 = arith.constant dense<0.000000e+00> : vector<128x128xf32>
      %224 = tpu.matmul %157, %197, %cst_37 {dimension_numbers = #tpu.dot_dimension_numbers<[1], [0], [0], [1], [0, 0, 1, 1], [], []>, precision = #tpu.contract_precision<fp32>} : vector<128x8xf32>, vector<8x128xf32>, vector<128x128xf32> -> vector<128x128xf32>
      %225 = vector.broadcast %210 : vector<128x1xf32> to vector<128x128xf32>
      %226 = vector.broadcast %168 : vector<1x128xf32> to vector<128x128xf32>
      %227 = arith.addf %225, %226 : vector<128x128xf32>
      %228 = arith.addf %227, %223 : vector<128x128xf32>
      %cst_38 = arith.constant 0.000000e+00 : f32
      %229 = vector.broadcast %cst_38 : f32 to vector<128x128xf32>
      %230 = arith.maximumf %228, %229 : vector<128x128xf32>
      %231 = vector.broadcast %221 : vector<128x1xf32> to vector<128x128xf32>
      %232 = vector.broadcast %179 : vector<1x128xf32> to vector<128x128xf32>
      %233 = arith.addf %231, %232 : vector<128x128xf32>
      %234 = arith.addf %233, %224 : vector<128x128xf32>
      %cst_39 = arith.constant 0.000000e+00 : f32
      %235 = vector.broadcast %cst_39 : f32 to vector<128x128xf32>
      %236 = arith.maximumf %234, %235 : vector<128x128xf32>
      %237 = tpu.iota {dimensions = array<i32: 0>} : vector<128x128xi32>
      %238 = tpu.iota {dimensions = array<i32: 1>} : vector<128x128xi32>
      %239 = arith.cmpi sgt, %238, %237 : vector<128x128xi32>
      %cst_40 = arith.constant 3.600000e+01 : f32
      %240 = vector.broadcast %cst_40 : f32 to vector<128x128xf32>
      %241 = arith.cmpf olt, %230, %240 : vector<128x128xf32>
      %242 = arith.andi %239, %241 : vector<128x128xi1>
      %243 = vector.broadcast %222 : vector<128x1xf32> to vector<128x128xf32>
      %244 = vector.broadcast %102 : vector<1x128xf32> to vector<128x128xf32>
      %245 = arith.mulf %243, %244 : vector<128x128xf32>
      %cst_41 = arith.constant 0.000000e+00 : f32
      %246 = vector.broadcast %cst_41 : f32 to vector<128x128xf32>
      %247 = arith.select %242, %245, %246 : vector<128x128xi1>, vector<128x128xf32>
      %248 = arith.mulf %230, %236 : vector<128x128xf32>
      %249 = math.sqrt %248 : vector<128x128xf32>
      %250 = arith.addf %230, %236 : vector<128x128xf32>
      %251 = arith.addf %249, %249 : vector<128x128xf32>
      %252 = arith.subf %250, %251 : vector<128x128xf32>
      %253 = arith.mulf %252, %247 : vector<128x128xf32>
      %254 = vector.shape_cast %253 : vector<128x128xf32> to vector<1x128x128xf32>
      %cst_42 = arith.constant dense<0.000000e+00> : vector<1xf32>
      %255 = vector.multi_reduction <add>, %254, %cst_42 [1, 2] : vector<1x128x128xf32> to vector<1xf32>
      %256 = vector.shape_cast %255 : vector<1xf32> to vector<1x1x1xf32>
      %257 = vector.extract %256[0, 0, 0] : f32 from vector<1x1x1xf32>
      %258 = vector.broadcast %257 : f32 to vector<1x1xf32>
      %259 = arith.addf %198, %258 : vector<1x1xf32>
      %260 = vector.shape_cast %247 : vector<128x128xf32> to vector<1x128x128xf32>
      %cst_43 = arith.constant dense<0.000000e+00> : vector<1xf32>
      %261 = vector.multi_reduction <add>, %260, %cst_43 [1, 2] : vector<1x128x128xf32> to vector<1xf32>
      %262 = vector.shape_cast %261 : vector<1xf32> to vector<1x1x1xf32>
      %263 = vector.extract %262[0, 0, 0] : f32 from vector<1x1x1xf32>
      %264 = vector.broadcast %263 : f32 to vector<1x1xf32>
      %265 = arith.addf %199, %264 : vector<1x1xf32>
      %266 = arith.addf %259, %259 : vector<1x1xf32>
      %267 = arith.addf %265, %265 : vector<1x1xf32>
      %268 = arith.addf %267, %107 : vector<1x1xf32>
      %cst_44 = arith.constant 9.99999997E-7 : f32
      %269 = vector.broadcast %cst_44 : f32 to vector<1x1xf32>
      %270 = arith.addf %268, %269 : vector<1x1xf32>
      %271 = arith.divf %266, %270 : vector<1x1xf32>
      %272 = arith.index_cast %c0_i32 : i32 to index
      %c4_45 = arith.constant 4 : index
      %c0_46 = arith.constant 0 : index
      %273 = vector.load %arg4[%272, %c4_45, %c0_46] : memref<1x8x1xf32, #tpu.memory_space<vmem>>, vector<1x1x1xf32>
      %274 = vector.shape_cast %273 : vector<1x1x1xf32> to vector<1x1xf32>
      %275 = vector.shape_cast %271 : vector<1x1xf32> to vector<1x1x1xf32>
      tpu.vector_store %arg4[%272, %c4_45, %c0_46], %275 {strides = array<i32>} : memref<1x8x1xf32, #tpu.memory_space<vmem>>, vector<1x1x1xf32>,
    } else {
    }
    %c1_i32_28 = arith.constant 1 : i32
    return
  }
  func.func @transform_0(%arg0: i32, %arg1: memref<2xi32, #tpu.memory_space<smem>>) -> (i32, i32, i32) {
    %c0_i32 = arith.constant 0 : i32
    %c0_i32_0 = arith.constant 0 : i32
    %c0_i32_1 = arith.constant 0 : i32
    return %arg0, %c0_i32, %c0_i32_0 : i32, i32, i32
  }
  func.func @transform_1(%arg0: i32, %arg1: memref<2xi32, #tpu.memory_space<smem>>) -> (i32, i32, i32) {
    %c0_i32 = arith.constant 0 : i32
    %c0_i32_0 = arith.constant 0 : i32
    %c0_i32_1 = arith.constant 0 : i32
    return %arg0, %c0_i32, %c0_i32_0 : i32, i32, i32
  }
  func.func @transform_2(%arg0: i32, %arg1: memref<2xi32, #tpu.memory_space<smem>>) -> (i32, i32, i32) {
    %c0_i32 = arith.constant 0 : i32
    %c0_i32_0 = arith.constant 0 : i32
    %c0_i32_1 = arith.constant 0 : i32
    return %arg0, %c0_i32, %c0_i32_0 : i32, i32, i32
  }
}

</mosaic_0001>

<bundles_post_ra>
// kernel: tpu_custom_call.1
= control target key start
LH: loop header
LB: loop body
LE: loop exit
PB: predicated region body
PF: predicated region fallthrough
CT: control target
= control target key end

     0   :  { %s5814_s0 = inlined_call_operand.vmem [shape: s32[2], index: 0, kind: input, shape index: {}]   ;;  %s5815_s1 = inlined_call_operand.vmem [shape: f32[2,56,32], index: 1, kind: input, shape index: {}]   ;;  %s5816_s2 = inlined_call_operand.vmem [shape: f32[2,8,128], index: 2, kind: input, shape index: {}]   ;;  %s5817_s3 = inlined_call_operand.vmem [shape: f32[2,8,1], index: 3, kind: output, shape index: {}]  }
   0x1   :  { %s8_s14 = sshll.u32 %s5814_s0, 4  ;;  %s9_s14 = int_to_ptr.vmem [resolvable:$true] %s8_s14 }
   0x2   :  { %s4385_s15 = scalar_lea.vmem %s9_s14, 16  ;;  %p4390_p1 = scmp.lt.s32.totalorder %s9_s14, %s9_s14 }
   0x3   :  { %p4386_p0 = scmp.ne.s32.totalorder %s9_s14, %s4385_s15  ;;  %p4391_p2 = scmp.lt.s32.totalorder %s4385_s15, %s4385_s15 }
   0x5   :  { %p4392_p3 = por %p4391_p2, %p4390_p1 }
   0x7   :  { %p4393_p4 = pnand %p4392_p3, %p4386_p0 }
   0x9   :  { %4396 = shalt.err (!%p4393_p4)  }
   0xa   :  { %s4407_s16 = smov [#allocation3]  }
   0xb   :  { %11 = dma.vmem_to_smem %s9_s14, 16, %s4407_s16, [#allocation2] }
   0xc   :  { %4401 = dma.done.wait [#allocation2], 16 }
   0xd   :  { %4402 = vsyncadd [#allocation2], 4294967280 }
   0xe   :  { %13 = sfence }
   0xf   :  { %s4438_s17 = smov 0  }
  0x10 LB: > { %s4444_s0 = sadd.s32 4294967295, %s4405_s17   ;;  %p3593_p5 = scmp.ge.s32.totalorder %s4405_s17, 1  ;;  %s4405_s17 = sphi %s4438_s17, %s19_s17  }
  0x11   : > { %p128_p6 = scmp.lt.s32.totalorder %s4405_s17, 3 }
  0x13   : > { %p129_p7 = pnand %p3593_p5, %p128_p6 }
  0x15   : > { %132 = sbr.rel (%p129_p7) target bundleno = 1186 (0x4a2), region = 28 }
  0x1c   : > { %p153_p8 = scmp.lt.s32.totalorder %s4444_s0, 1  ;;  %v5819_v0 = vlaneseq  ;;  %vm416_vm0 = vcmask 1024   ;;  %vm173_vm1 = vcmask 253952   ;;  %v4408_v3 = vmov 0.0   ;;  %s4533_s30 = sld [smem:[#allocation3 + %s4444_s0]] }
  0x1d   : > { %vm296_vm2 = vcmask 1041408   ;;  %vm312_vm3 = vcmask 1043456   ;;  %vm227_vm4 = vcmask 256000   ;;  %vm276_vm5 = vcmask 1040384  }
  0x1e   : > { %s4450_s18 = scalar_select %p153_p8, %s4444_s0, 1  ;;  %v4453_v1 = vshrl.u32 %v5819_v0, 7  ;;  %vm325_vm6 = vcmask 1042432   ;;  %vm333_vm7 = vcmask 261120   ;;  %vm335_vm8 = vcmask 259072  }
  0x1f   : > { %vm348_vm11 = vcmask 1046528   ;;  %vm409_vm12 = vcmask 0  }
  0x20   : > { %5859 = vst [vmem:[#allocation5_spill] sm:$0xff] %v4453_v1  ;;  %s4276_s19 = smul.u32 56, %s4450_s18  ;;  %v5820_v2 = vsub.s32 0, %v4453_v1  ;;  %s3595_s20 = sshll.u32 %s4450_s18, 3  ;;  %v204_v59 = vsub.s32 1, %v4453_v1  ;;  %v210_v60 = vsub.s32 4, %v4453_v1 }
  0x21   : > { %s4463_s23 = scalar_lea.vmem %s5817_s3, %s3595_s20  ;;  %s161_s29 = scalar_lea.vmem %s5816_s2, %s3595_s20 }
  0x22   : > { %s157_s26 = scalar_lea.vmem %s5815_s1, %s4276_s19  ;;  %417 = vst.msk [vmem:[%s4463_s23 + $0x6] sm:$0x3] %vm416_vm0, %v4408_v3  ;;  %v4505_v57 = vld [vmem:[%s161_s29] sm:$0xff]  ;;  %p3597_p9 = scmp.eq.s32.totalorder %s4533_s30, 0 }
  0x23   : > { %v4470_v4 = vld [vmem:[%s157_s26] sm:$0xff]  ;;  %v167_v5 = vld [vmem:[%s157_s26 + $0x8] sm:$0xff]  ;;  %v169_v10 = vld [vmem:[%s157_s26 + $0x18] sm:$0xff]  ;;  %5860 = vst [vmem:[#allocation6_spill] sm:$0xff] %v4505_v57 }
  0x24   : > { %v174_v6 = vsel %vm173_vm1, %v4470_v4, 0.0  ;;  %v186_v7 = vmul.f32 %v4470_v4, %v4470_v4  ;;  %v4479_v8 = vrot.slane %v4470_v4, %v5820_v2  ;;  %v266_v9 = vrot.slane %v167_v5, 3  ;;  %v170_v11 = vld [vmem:[%s157_s26 + $0x20] sm:$0xff]  ;;  %v4481_v12 = vld [vmem:[%s157_s26 + $0x28] sm:$0xff]  ;;  %v168_v13 = vld [vmem:[%s157_s26 + $0x10] sm:$0xff] }
  0x25   : > { %175 = vadd.xlane.f32.xlu0 %v174_v6  ;;  %v4483_v14 = vld [vmem:[%s157_s26 + $0x30] sm:$0xff]  ;;  %v297_v15 = vrot.slane %v169_v10, 6  ;;  %v298_v16 = vrot.slane %v170_v11, 6  ;;  %v300_v17 = vrot.slane %v4481_v12, 6  ;;  %v313_v18 = vrot.slane %v4481_v12, 4 }
  0x26   : > { %v188_v19 = vrot.slane %v186_v7, 1  ;;  %v191_v20 = vrot.slane %v186_v7, 2  ;;  %v268_v21 = vsub.f32 %v4470_v4, %v266_v9  ;;  %v269_v22 = vsub.f32 %v167_v5, %v266_v9  ;;  %414 = vst.msk [vmem:[%s4463_s23 + $0x4] sm:$0x1] %vm409_vm12, %v4408_v3 }
  0x27   : > { %v299_v23 = vsel %vm296_vm2, %v297_v15, %v298_v16  ;;  %v301_v24 = vsel %vm296_vm2, %v298_v16, %v300_v17  ;;  %v305_v25 = vsub.f32 %v167_v5, %v297_v15  ;;  %v314_v26 = vrot.slane %v4483_v14, 4 }
  0x28   : > { %v190_v27 = vadd.f32 %v188_v19, %v186_v7  ;;  %v270_v28 = vmul.f32 %v268_v21, %v268_v21  ;;  %v271_v29 = vmul.f32 %v269_v22, %v269_v22  ;;  %v306_v30 = vsub.f32 %v168_v13, %v299_v23 }
  0x29   : > { %v307_v31 = vsub.f32 %v169_v10, %v301_v24  ;;  %v308_v32 = vmul.f32 %v305_v25, %v305_v25  ;;  %v315_v33 = vsel %vm312_vm3, %v313_v18, %v314_v26  ;;  %v386_v5 = vrot.slane %v4505_v57, 3 }
  0x2a   : > { %v272_v34 = vmul.f32 %v270_v28, %v4479_v8  ;;  %v273_v35 = vmul.f32 %v271_v29, %v4479_v8  ;;  %v309_v36 = vmul.f32 %v306_v30, %v306_v30  ;;  %v193_v37 = vadd.f32 %v191_v20, %v190_v27 }
  0x2b   : > { %v310_v38 = vmul.f32 %v307_v31, %v307_v31  ;;  %v319_v39 = vmul.f32 %v313_v18, %v308_v32  ;;  %v349_v6 = vrot.slane %v4481_v12, 1  ;;  %v350_v7 = vrot.slane %v4483_v14, 1 }
  0x2c   : > { %v277_v40 = vrot.slane %v272_v34, 7  ;;  %v278_v41 = vrot.slane %v273_v35, 7  ;;  %v320_v42 = vmul.f32 %v315_v33, %v309_v36  ;;  %4313 = vrsqrt.f32 %v193_v37 }
  0x2d   : > { %v321_v43 = vmul.f32 %v314_v26, %v310_v38  ;;  %v326_v44 = vrot.slane %v319_v39, 5  ;;  %vm196_vm9 = vcmp.eq.f32.partialorder %v193_v37, inf  ;;  %v199_v55 = vand.u32 2147483648, %v193_v37 }
  0x2e   : > { %v279_v45 = vsel %vm276_vm5, %v277_v40, %v278_v41  ;;  %v327_v46 = vrot.slane %v320_v42, 5  ;;  %vm198_vm10 = vcmp.eq.f32.partialorder %v193_v37, 0.0  ;;  %v247_v10 = vrot.slane %v4470_v4, 7 }
  0x2f   : > { %v281_v47 = vsel %vm227_vm4, %v279_v45, 0.0  ;;  %v329_v48 = vrot.slane %v321_v43, 5  ;;  %v392_v15 = vsub.s32 6, %v4453_v1  ;;  %v388_v17 = vsub.f32 %v4505_v57, %v386_v5 }
  0x30   : > { %282 = vadd.xlane.f32.xlu1 %v281_v47  ;;  %v328_v49 = vsel %vm325_vm6, %v326_v44, %v327_v46  ;;  %v351_v18 = vsel %vm348_vm11, %v349_v6, %v350_v7  ;;  %v355_v21 = vsel %vm335_vm8, %v350_v7, 0.0  ;;  %v373_v36 = vrot.slane %v4505_v57, 6 }
  0x31   : > { %v330_v50 = vsel %vm325_vm6, %v327_v46, %v329_v48  ;;  %v334_v51 = vsel %vm333_vm7, %v328_v49, 0.0  ;;  %v4516_v20 = vrot.slane %v4505_v57, %v392_v15  ;;  %v354_v14 = vsel %vm333_vm7, %v351_v18, 0.0 }
  0x32   : > { %v336_v52 = vsel %vm335_vm8, %v330_v50, 0.0  ;;  %v389_v22 = vmul.f32 %v388_v17, %v388_v17  ;;  %v356_v24 = vadd.f32 %v355_v21, %v354_v14  ;;  %v375_v38 = vsel %vm276_vm5, %v373_v36, 0.0 }
  0x33   : > { %v337_v53 = vadd.f32 %v336_v52, %v334_v51  ;;  %5861 = vst [vmem:[#allocation7_spill] sm:$0xff] %v4516_v20 }
  0x34   : > { %v394_v25 = vmul.f32 %v4516_v20, %v389_v22 }
  0x35   : > { %338 = vadd.xlane.f32.xlu0 %v337_v53 }
  0x36   : > { %v4314_v54 = vpop.eup %4313  ;;  %v395_v30 = vsel %vm325_vm6, %v394_v25, 0.0 }
  0x37   : > { %v195_v56 = vmul.f32 %v4314_v54, %v193_v37 }
  0x39   : > { %v197_v58 = vsel %vm196_vm9, %v193_v37, %v195_v56 }
  0x3a   : > { %v200_v61 = vsel %vm198_vm10, %v199_v55, %v197_v58 }
  0x3b   : > { %v242_v62 = vrot.slane %v200_v61, 3  ;;  %v201_v63 = vadd.f32 1e-06, %v200_v61 }
  0x3d   : > { %v244_v9 = vsub.f32 %v200_v61, %v242_v62  ;;  %v205_v11 = vrot.slane %v201_v63, %v204_v59  ;;  %v211_v13 = vrot.slane %v201_v63, %v210_v60 }
  0x3f   : > { %v245_v16 = vmul.f32 %v244_v9, %v244_v9  ;;  %4315 = vrcp.f32 %v205_v11 }
  0x40   : > { %4317 = vrcp.f32 %v211_v13 }
  0x41   : > { %v249_v19 = vmul.f32 %v247_v10, %v245_v16 }
  0x43   : > { %v251_v12 = vrot.slane %v249_v19, 1 }
  0x45   : > { %v253_v23 = vsel %vm173_vm1, %v251_v12, 0.0 }
  0x46   : > { %254 = vadd.xlane.f32.xlu1 %v253_v23 }
  0x49   : > { %v4316_v26 = vpop.eup %4315 }
  0x4a   : > { %v4318_v27 = vpop.eup %4317  ;;  %357 = vadd.xlane.f32.xlu1 %v356_v24  ;;  %v207_v28 = vmul.f32 %v4316_v26, %v4470_v4 }
  0x4b   : > { %v213_v29 = vmul.f32 %v4318_v27, %v4470_v4 }
  0x4d   : > { %v215_v31 = vrot.slane %v213_v29, 3 }
  0x4e   : > { %396 = vadd.xlane.f32.xlu1 %v395_v30 }
  0x4f   : > { %v217_v32 = vsub.f32 %v207_v28, %v215_v31 }
  0x51   : > { %v218_v33 = vmul.f32 %v217_v32, %v217_v32 }
  0x53   : > { %v223_v34 = vmul.f32 %v4479_v8, %v218_v33 }
  0x55   : > { %v225_v35 = vrot.slane %v223_v34, 1 }
  0x57   : > { %v228_v37 = vsel %vm227_vm4, %v225_v35, 0.0 }
  0x58   : > { %229 = vadd.xlane.f32.xlu0 %v228_v37 }
  0x5c   : > { %376 = vadd.xlane.f32.xlu0 %v375_v38 }
  0xb2   : > { %v176_v4 = vpop.xlane.xlu0 %175 }
  0xb3   : > { %v177_v39 = vrot.slane %v176_v4, 4 }
  0xb5   : > { %v178_v40 = vadd.f32 %v177_v39, %v176_v4 }
  0xb7   : > { %v179_v41 = vrot.slane %v178_v40, 2 }
  0xb9   : > { %v180_v42 = vadd.f32 %v179_v41, %v178_v40 }
  0xbb   : > { %v181_v8 = vrot.slane %v180_v42, 1 }
  0xbd   : > { %v182_v43 = vadd.f32 %v181_v8, %v180_v42  ;;  %v283_v44 = vpop.xlane.xlu1 %282 }
  0xbe   : > { %v284_v50 = vrot.slane %v283_v44, 4 }
  0xbf   : > { %4277 = vpush %v182_v43 }
  0xc0   : > { %v285_v54 = vadd.f32 %v284_v50, %v283_v44 }
  0xc2   : > { %v339_v47 = vpop.xlane.xlu0 %338  ;;  %v286_v61 = vrot.slane %v285_v54, 2 }
  0xc3   : > { %v340_v51 = vrot.slane %v339_v47, 4 }
  0xc4   : > { %v287_v15 = vadd.f32 %v286_v61, %v285_v54 }
  0xc5   : > { %v341_v55 = vadd.f32 %v340_v51, %v339_v47 }
  0xc6   : > { %v288_v23 = vrot.slane %v287_v15, 1 }
  0xc7   : > { %v342_v63 = vrot.slane %v341_v55, 2 }
  0xc8   : > { %v289_v30 = vadd.f32 %v288_v23, %v287_v15 }
  0xc9   : > { %v343_v16 = vadd.f32 %v342_v63, %v341_v55 }
  0xcb   : > { %v344_v24 = vrot.slane %v343_v16, 1 }
  0xcd   : > { %v345_v32 = vadd.f32 %v344_v24, %v343_v16 }
  0xd3   : > { %v255_v45 = vpop.xlane.xlu1 %254 }
  0xd4   : > { %v256_v48 = vrot.slane %v255_v45, 4 }
  0xd6   : > { %v257_v53 = vadd.f32 %v256_v48, %v255_v45 }
  0xd7   : > { %v358_v46 = vpop.xlane.xlu1 %357 }
  0xd8   : > { %v359_v52 = vrot.slane %v358_v46, 4  ;;  %v258_v59 = vrot.slane %v257_v53, 2 }
  0xda   : > { %v360_v56 = vadd.f32 %v359_v52, %v358_v46  ;;  %v259_v10 = vadd.f32 %v258_v59, %v257_v53 }
  0xdb   : > { %v397_v49 = vpop.xlane.xlu1 %396 }
  0xdc   : > { %v398_v3 = vrot.slane %v397_v49, 4  ;;  %v361_v5 = vrot.slane %v360_v56, 2  ;;  %v260_v14 = vrot.slane %v259_v10, 1 }
  0xde   : > { %v399_v58 = vadd.f32 %v398_v3, %v397_v49  ;;  %v362_v12 = vadd.f32 %v361_v5, %v360_v56  ;;  %v261_v29 = vadd.f32 %v260_v14, %v259_v10 }
  0xe0   : > { %v400_v7 = vrot.slane %v399_v58, 2  ;;  %v363_v27 = vrot.slane %v362_v12, 1 }
  0xe2   : > { %v401_v18 = vadd.f32 %v400_v7, %v399_v58  ;;  %v364_v33 = vadd.f32 %v363_v27, %v362_v12 }
  0xe4   : > { %v402_v28 = vrot.slane %v401_v18, 1 }
  0xe5   : > { %v230_v60 = vpop.xlane.xlu0 %229 }
  0xe6   : > { %v231_v62 = vrot.slane %v230_v60, 4  ;;  %v403_v35 = vadd.f32 %v402_v28, %v401_v18 }
  0xe8   : > { %v232_v6 = vadd.f32 %v231_v62, %v230_v60 }
  0xe9   : > { %v377_v9 = vpop.xlane.xlu0 %376 }
  0xea   : > { %v233_v11 = vrot.slane %v232_v6, 2  ;;  %v378_v13 = vrot.slane %v377_v9, 4 }
  0xec   : > { %v379_v17 = vadd.f32 %v378_v13, %v377_v9  ;;  %v234_v19 = vadd.f32 %v233_v11, %v232_v6 }
  0xee   : > { %v380_v21 = vrot.slane %v379_v17, 2  ;;  %v235_v22 = vrot.slane %v234_v19, 1 }
  0xf0   : > { %v381_v25 = vadd.f32 %v380_v21, %v379_v17  ;;  %v236_v26 = vadd.f32 %v235_v22, %v234_v19  ;;  %s4278_s4 = spop %4277 }
  0xf1   : > { %v184_v36 = vstv %s4278_s4 }
  0xf2   : > { %4279 = vpush %v236_v26  ;;  %v382_v31 = vrot.slane %v381_v25, 1  ;;  %v185_v37 = vadd.f32 1e-06, %v184_v36 }
  0xf3   : > { %4281 = vpush %v261_v29 }
  0xf4   : > { %4283 = vpush %v289_v30  ;;  %v383_v34 = vadd.f32 %v382_v31, %v381_v25  ;;  %4319 = vrcp.f32 %v185_v37 }
  0xf5   : > { %4285 = vpush %v345_v32 }
  0xf6   : > { %4287 = vpush %v364_v33 }
  0xf7   : > { %4289 = vpush %v383_v34 }
  0xf8   : > { %4291 = vpush %v403_v35 }
  0xfe   : > { %v4320_v38 = vpop.eup %4319 }
 0x123   : > { %s4280_s5 = spop %4279 }
 0x124   : > { %v238_v4 = vstv %s4280_s5  ;;  %s4282_s6 = spop %4281 }
 0x125   : > { %v240_v39 = vmul.f32 %v4320_v38, %v238_v4  ;;  %v263_v40 = vstv %s4282_s6  ;;  %s4284_s7 = spop %4283 }
 0x126   : > { %v264_v41 = vmul.f32 %v4320_v38, %v263_v40  ;;  %v291_v42 = vstv %s4284_s7  ;;  %s4286_s8 = spop %4285 }
 0x127   : > { %410 = vst.msk [vmem:[%s4463_s23] sm:$0x1] %vm409_vm12, %v240_v39  ;;  %v292_v8 = vmul.f32 %v4320_v38, %v291_v42  ;;  %s4288_s9 = spop %4287  ;;  %v347_v51 = vstv %s4286_s8 }
 0x128   : > { %411 = vst.msk [vmem:[%s4463_s23 + $0x1] sm:$0x1] %vm409_vm12, %v264_v41  ;;  %v366_v43 = vstv %s4288_s9  ;;  %s4539_s10 = spop %4289 }
 0x129   : > { %412 = vst.msk [vmem:[%s4463_s23 + $0x2] sm:$0x1] %vm409_vm12, %v292_v8  ;;  %v367_v44 = vmul.f32 0.5, %v366_v43  ;;  %v5818_v45 = vstv %s4539_s10  ;;  %s4292_s11 = spop %4291 }
 0x12a   : > { %v406_v46 = vadd.f32 1e-06, %v5818_v45  ;;  %v405_v49 = vstv %s4292_s11 }
 0x12b   : > { %v368_v47 = vadd.f32 1e-06, %v367_v44 }
 0x12c   : > { %4321 = vrcp.f32 %v406_v46 }
 0x12d   : > { %4323 = vrcp.f32 %v368_v47 }
 0x134   : > { %422 = sbr.rel (%p3597_p9) target bundleno = 1186 (0x4a2), region = 32 }
 0x136   : > { %v4322_v48 = vpop.eup %4321 }
 0x137   : > { %v4324_v50 = vpop.eup %4323  ;;  %v408_v52 = vmul.f32 %v4322_v48, %v405_v49 }
 0x138   : > { %v370_v3 = vmul.f32 %v4324_v50, %v347_v51 }
 0x139   : > { %413 = vst.msk [vmem:[%s4463_s23 + $0x3] sm:$0x1] %vm409_vm12, %v408_v52 }
 0x13a   : > { %415 = vst.msk [vmem:[%s4463_s23 + $0x5] sm:$0x1] %vm409_vm12, %v370_v3 }
 0x13b   : > { %423 = vxpose.xlu0.b32.start.end [1/1] (short) %v4505_v57, 128  ;;  %v5821_v53 = vmov 6   ;;  %vm468_vm13 = vcmp.ge.s32.totalorder %v4453_v1, 3  ;;  %vm469_vm14 = vcmp.lt.s32.totalorder %v4453_v1, 6  ;;  %vm465_vm15 = vcmp.lt.s32.totalorder %v4453_v1, 3  ;;  %s4411_s12 = smov 127   ;;  %s4412_s13 = smov 126  }
 0x13c   : > { %4325 = vset.pattern.permute.xlu1 %v5821_v53  ;;  %vm470_vm0 = vmand %vm468_vm13, %vm469_vm14  ;;  %v4410_v54 = vmov 0.0   ;;  %vm633_vm1 = vcmask 64512   ;;  %v5823_v8 = vmov 0  }
 0x13d   : > { %v466_v55 = vsel %vm465_vm15, -2.0, %v4410_v54  ;;  %v471_v56 = vsel %vm470_vm0, -2.0, %v4410_v54 }
 0x13e   : > { %v467_v58 = vmul.f32 %v466_v55, %v4505_v57  ;;  %v472_v59 = vmul.f32 %v471_v56, %v4505_v57 }
 0x140   : > { %v4558_v60 = vand.u32 4294901760, %v467_v58  ;;  %v4560_v61 = vand.u32 4294901760, %v472_v59 }
 0x142   : > { %3804 = vmatprep.subr.mxu0 %v4558_v60  ;;  %3960 = vmatprep.subr.mxu1 %v4560_v61  ;;  %v4568_v62 = vsub.f32 %v467_v58, %v4558_v60  ;;  %v4571_v63 = vsub.f32 %v472_v59, %v4560_v61 }
 0x143   : > { %3805 = vmatpush3.msra.mxu0 %v4558_v60  ;;  %3961 = vmatpush3.msra.mxu1 %v4560_v61 }
 0x144   : > { %v4574_v5 = vand.u32 4294901760, %v4568_v62  ;;  %v4577_v6 = vand.u32 4294901760, %v4571_v63 }
 0x146   : > { %v912_v7 = vsub.f32 %v4568_v62, %v4574_v5  ;;  %v2003_v9 = vsub.f32 %v4571_v63, %v4577_v6 }
 0x148   : > { %v913_v10 = vand.u32 4294901760, %v912_v7  ;;  %v2004_v11 = vand.u32 4294901760, %v2003_v9 }
 0x14a   : > { %3830 = vmatprep.subr.mxu0 %v913_v10  ;;  %3986 = vmatprep.subr.mxu1 %v2004_v11 }
 0x164   : > { %4326 = vset.pattern.permute.xlu0 %v5821_v53 }
 0x1bb   : > { %v439_v13 = vpop.trf.xlu0 }
 0x1bc   : > { %v4583_v15 = vmul.f32 %v439_v13, %v439_v13  ;;  %v635_v16 = vsel %vm633_vm1, %v439_v13, 0  ;;  %3178 = vperm.xlu1 %4325, %v439_v13  }
 0x1bd   : > { %v4586_v17 = vand.u32 4294901760, %v635_v16 }
 0x1be   : > { %505 = vrot.lane.b32.xlu0 %v4583_v15, %s4411_s12 }
 0x1bf   : > { %v4591_v18 = vsub.f32 %v635_v16, %v4586_v17  ;;  %v440_v19 = vpop.trf.xlu0 }
 0x1c0   : > { %v638_v12 = vsel %vm633_vm1, %v440_v19, 0  ;;  %569 = vrot.lane.b32.xlu1 %v4583_v15, %s4412_s13  ;;  %v4612_v29 = vmul.f32 %v440_v19, %v440_v19 }
 0x1c1   : > { %v4596_v14 = vand.u32 4294901760, %v638_v12  ;;  %v4599_v21 = vand.u32 4294901760, %v4591_v18 }
 0x1c3   : > { %v4602_v22 = vsub.f32 %v638_v12, %v4596_v14  ;;  %v441_v23 = vpop.trf.xlu0  ;;  %v751_v24 = vsub.f32 %v4591_v18, %v4599_v21 }
 0x1c4   : > { %v641_v25 = vsel %vm633_vm1, %v441_v23, 0  ;;  %3182 = vperm.xlu1 %4325, %v440_v19   ;;  %v4660_v51 = vmul.f32 %v441_v23, %v441_v23 }
 0x1c5   : > { %v4607_v26 = vand.u32 4294901760, %v641_v25  ;;  %v752_v27 = vand.u32 4294901760, %v751_v24  ;;  %v4610_v28 = vand.u32 4294901760, %v4602_v22 }
 0x1c6   : > { %5863 = vst [vmem:[#allocation9_spill] sm:$0xff] %v4660_v51 }
 0x1c7   : > { %v4615_v30 = vsub.f32 %v641_v25, %v4607_v26  ;;  %v442_v31 = vpop.trf.xlu0  ;;  %3806 = vmatprep.mubr.f32.mxu0 %v752_v27  ;;  %3962 = vmatprep.mubr.f32.mxu1 %v752_v27  ;;  %v761_v32 = vsub.f32 %v4602_v22, %v4610_v28 }
 0x1c8   : > { %v644_v33 = vsel %vm633_vm1, %v442_v31, 0  ;;  %507 = vrot.lane.b32.xlu1 %v4612_v29, %s4411_s12  ;;  %3190 = vperm.xlu0 %4326, %v442_v31   ;;  %v4694_v12 = vmul.f32 %v442_v31, %v442_v31 }
 0x1c9   : > { %v4622_v34 = vand.u32 4294901760, %v644_v33  ;;  %v762_v35 = vand.u32 4294901760, %v761_v32  ;;  %v4625_v36 = vand.u32 4294901760, %v4615_v30 }
 0x1ca   : > { %5865 = vst [vmem:[#allocation11_spill] sm:$0xff] %v4694_v12 }
 0x1cb   : > { %v4628_v37 = vsub.f32 %v644_v33, %v4622_v34  ;;  %v4630_v38 = vpop.trf.xlu0  ;;  %3807 = vmatmul.mubr.f32.vlgmr.msra.gmra.mrb[0].mxu0 %v762_v35  ;;  %3963 = vmatmul.mubr.f32.vlgmr.msra.gmra.mrb[0].mxu1 %v762_v35  ;;  %v771_v4 = vsub.f32 %v4615_v30, %v4625_v36 }
 0x1cc   : > { %v647_v39 = vsel %vm633_vm1, %v4630_v38, 0  ;;  %571 = vrot.lane.b32.xlu1 %v4612_v29, %s4412_s13  ;;  %3831 = vmatpush3.msra.mxu0 %v913_v10 }
 0x1cd   : > { %v4638_v40 = vand.u32 4294901760, %v647_v39  ;;  %v772_v41 = vand.u32 4294901760, %v771_v4  ;;  %v4641_v42 = vand.u32 4294901760, %v4628_v37  ;;  %3987 = vmatpush3.msra.mxu1 %v2004_v11  ;;  %3856 = vmatprep.subr.mxu0 %v4568_v62 }
 0x1ce   : > { %4012 = vmatprep.subr.mxu1 %v4571_v63  ;;  %4327 = vset.pattern.permute.xlu0 %v5823_v8 }
 0x1cf   : > { %v4647_v43 = vsub.f32 %v647_v39, %v4638_v40  ;;  %v4649_v44 = vpop.trf.xlu0  ;;  %3809 = vmatprep.mubr.f32.mxu0 %v772_v41  ;;  %3965 = vmatprep.mubr.f32.mxu1 %v772_v41  ;;  %v781_v46 = vsub.f32 %v4628_v37, %v4641_v42 }
 0x1d0   : > { %5862 = vst [vmem:[#allocation8_spill] sm:$0xff] %v4649_v44  ;;  %v650_v47 = vsel %vm633_vm1, %v4649_v44, 0  ;;  %3186 = vperm.xlu1 %4325, %v441_v23  }
 0x1d1   : > { %v4655_v48 = vand.u32 4294901760, %v650_v47  ;;  %v782_v49 = vand.u32 4294901760, %v781_v46  ;;  %v4658_v50 = vand.u32 4294901760, %v4647_v43 }
 0x1d3   : > { %v4663_v52 = vsub.f32 %v650_v47, %v4655_v48  ;;  %v4665_v3 = vpop.trf.xlu0  ;;  %3810 = vmatmul.mubr.f32.gmra.mrb[2].mxu0 %v782_v49  ;;  %3966 = vmatmul.mubr.f32.gmra.mrb[2].mxu1 %v782_v49  ;;  %v791_v54 = vsub.f32 %v4647_v43, %v4658_v50 }
 0x1d4   : > { %5864 = vst [vmem:[#allocation10_spill] sm:$0xff] %v4665_v3  ;;  %v653_v55 = vsel %vm633_vm1, %v4665_v3, 0  ;;  %509 = vrot.lane.b32.xlu1 %v4660_v51, %s4411_s12 }
 0x1d5   : > { %v4673_v56 = vand.u32 4294901760, %v653_v55  ;;  %v792_v58 = vand.u32 4294901760, %v791_v54  ;;  %v4676_v59 = vand.u32 4294901760, %v4663_v52 }
 0x1d7   : > { %v4679_v7 = vsub.f32 %v653_v55, %v4673_v56  ;;  %v4681_v9 = vpop.trf.xlu0  ;;  %3812 = vmatprep.mubr.f32.mxu0 %v792_v58  ;;  %3968 = vmatprep.mubr.f32.mxu1 %v792_v58  ;;  %v801_v10 = vsub.f32 %v4663_v52, %v4676_v59 }
 0x1d8   : > { %v656_v11 = vsel %vm633_vm1, %v4681_v9, 0  ;;  %573 = vrot.lane.b32.xlu1 %v4660_v51, %s4412_s13 }
 0x1d9   : > { %v4689_v13 = vand.u32 4294901760, %v656_v11  ;;  %v802_v16 = vand.u32 4294901760, %v801_v10  ;;  %v4692_v19 = vand.u32 4294901760, %v4679_v7 }
 0x1db   : > { %v4697_v23 = vsub.f32 %v656_v11, %v4689_v13  ;;  %v4699_v24 = vpop.trf.xlu0  ;;  %3813 = vmatmul.mubr.f32.gmra.mrb[4].mxu0 %v802_v16  ;;  %3969 = vmatmul.mubr.f32.gmra.mrb[4].mxu1 %v802_v16  ;;  %v811_v25 = vsub.f32 %v4679_v7, %v4692_v19 }
 0x1dc   : > { %v659_v27 = vsel %vm633_vm1, %v4699_v24, 0  ;;  %511 = vrot.lane.b32.xlu1 %v4694_v12, %s4411_s12 }
 0x1dd   : > { %v4707_v32 = vand.u32 4294901760, %v659_v27  ;;  %v812_v31 = vand.u32 4294901760, %v811_v25  ;;  %v4710_v33 = vand.u32 4294901760, %v4697_v23 }
 0x1df   : > { %5866 = vst [vmem:[#allocation12_spill] sm:$0xff] %v4710_v33  ;;  %v4713_v35 = vsub.f32 %v659_v27, %v4707_v32  ;;  %v4715_v4 = vpop.trf.xlu0  ;;  %3815 = vmatprep.mubr.f32.mxu0 %v812_v31  ;;  %3971 = vmatprep.mubr.f32.mxu1 %v812_v31  ;;  %v821_v39 = vsub.f32 %v4697_v23, %v4710_v33 }
 0x1e0   : > { %v662_v41 = vsel %vm633_vm1, %v4715_v4, 0  ;;  %575 = vrot.lane.b32.xlu1 %v4694_v12, %s4412_s13  ;;  %v4745_v27 = vmul.f32 %v4630_v38, %v4630_v38 }
 0x1e1   : > { %v4723_v46 = vand.u32 4294901760, %v662_v41  ;;  %v822_v47 = vand.u32 4294901760, %v821_v39  ;;  %v4726_v49 = vand.u32 4294901760, %v4713_v35 }
 0x1e2   : > { %5869 = vst [vmem:[#allocation15_spill] sm:$0xff] %v4745_v27 }
 0x1e3   : > { %5867 = vst [vmem:[#allocation13_spill] sm:$0xff] %v4726_v49  ;;  %v4729_v54 = vsub.f32 %v662_v41, %v4723_v46  ;;  %v4731_v55 = vpop.trf.xlu0  ;;  %3816 = vmatmul.mubr.f32.gmra.mrb[6].mxu0 %v822_v47  ;;  %3972 = vmatmul.mubr.f32.gmra.mrb[6].mxu1 %v822_v47  ;;  %v831_v58 = vsub.f32 %v4713_v35, %v4726_v49 }
 0x1e4   : > { %v665_v10 = vsel %vm633_vm1, %v4731_v55, 0  ;;  %3194 = vperm.xlu1 %4325, %v4630_v38  }
 0x1e5   : > { %v4738_v11 = vand.u32 4294901760, %v665_v10  ;;  %v832_v16 = vand.u32 4294901760, %v831_v58  ;;  %v4741_v25 = vand.u32 4294901760, %v4729_v54 }
 0x1e7   : > { %5868 = vst [vmem:[#allocation14_spill] sm:$0xff] %v4741_v25  ;;  %v4748_v31 = vsub.f32 %v665_v10, %v4738_v11  ;;  %v4750_v39 = vpop.trf.xlu0  ;;  %3818 = vmatprep.mubr.f32.mxu0 %v832_v16  ;;  %3974 = vmatprep.mubr.f32.mxu1 %v832_v16  ;;  %v841_v41 = vsub.f32 %v4729_v54, %v4741_v25  ;;  %v5825_v10 = vmov 3  }
 0x1e8   : > { %v668_v47 = vsel %vm633_vm1, %v4750_v39, 0  ;;  %513 = vrot.lane.b32.xlu1 %v4745_v27, %s4411_s12 }
 0x1e9   : > { %v4758_v58 = vand.u32 4294901760, %v668_v47  ;;  %v842_v38 = vand.u32 4294901760, %v841_v41  ;;  %v4761_v45 = vand.u32 4294901760, %v4748_v31  ;;  %4328 = vset.pattern.permute.xlu1 %v5825_v10 }
 0x1eb   : > { %5870 = vst [vmem:[#allocation16_spill] sm:$0xff] %v4761_v45  ;;  %v4765_v16 = vsub.f32 %v668_v47, %v4758_v58  ;;  %v4767_v0 = vpop.trf.xlu0  ;;  %3819 = vmatmul.mubr.f32.gmra.mrb[8].mxu0 %v842_v38  ;;  %3975 = vmatmul.mubr.f32.gmra.mrb[8].mxu1 %v842_v38  ;;  %v851_v2 = vsub.f32 %v4748_v31, %v4761_v45 }
 0x1ec   : > { %v671_v53 = vsel %vm633_vm1, %v4767_v0, 0  ;;  %577 = vrot.lane.b32.xlu1 %v4745_v27, %s4412_s13  ;;  %v4782_v47 = vmul.f32 %v4649_v44, %v4649_v44 }
 0x1ed   : > { %v4775_v41 = vand.u32 4294901760, %v671_v53  ;;  %v852_v8 = vand.u32 4294901760, %v851_v2  ;;  %v4778_v10 = vand.u32 4294901760, %v4765_v16 }
 0x1ee   : > { %5872 = vst [vmem:[#allocation18_spill] sm:$0xff] %v4782_v47 }
 0x1ef   : > { %5871 = vst [vmem:[#allocation17_spill] sm:$0xff] %v4778_v10  ;;  %v4785_v38 = vsub.f32 %v671_v53, %v4775_v41  ;;  %v4787_v20 = vpop.trf.xlu0  ;;  %3821 = vmatprep.mubr.f32.mxu0 %v852_v8  ;;  %3977 = vmatprep.mubr.f32.mxu1 %v852_v8  ;;  %v861_v1 = vsub.f32 %v4765_v16, %v4778_v10 }
 0x1f0   : > { %5873 = vst [vmem:[#allocation19_spill] sm:$0xff] %v4787_v20  ;;  %v4793_v2 = vmul.f32 %v4787_v20, %v4787_v20  ;;  %v674_v57 = vsel %vm633_vm1, %v4787_v20, 0  ;;  %515 = vrot.lane.b32.xlu1 %v4782_v47, %s4411_s12 }
 0x1f1   : > { %v4799_v44 = vand.u32 4294901760, %v674_v57  ;;  %v862_v53 = vand.u32 4294901760, %v861_v1  ;;  %v4802_v27 = vand.u32 4294901760, %v4785_v38 }
 0x1f2   : > { %595 = vrot.lane.b32.xlu0 %v4793_v2, %s4412_s13 }
 0x1f3   : > { %5874 = vst [vmem:[#allocation20_spill] sm:$0xff] %v4802_v27  ;;  %v4807_v8 = vsub.f32 %v674_v57, %v4799_v44  ;;  %v4809_v12 = vpop.trf.xlu0  ;;  %3822 = vmatmul.mubr.f32.gmra.mrb[10].mxu0 %v862_v53  ;;  %3978 = vmatmul.mubr.f32.gmra.mrb[10].mxu1 %v862_v53  ;;  %v871_v20 = vsub.f32 %v4785_v38, %v4802_v27 }
 0x1f4   : > { %5875 = vst [vmem:[#allocation21_spill] sm:$0xff] %v4809_v12  ;;  %v4815_v10 = vmul.f32 %v4809_v12, %v4809_v12  ;;  %v677_v1 = vsel %vm633_vm1, %v4809_v12, 0  ;;  %579 = vrot.lane.b32.xlu1 %v4782_v47, %s4412_s13  ;;  %v4828_v53 = vmul.f32 %v4665_v3, %v4665_v3 }
 0x1f5   : > { %v4821_v45 = vand.u32 4294901760, %v677_v1  ;;  %v872_v57 = vand.u32 4294901760, %v871_v20  ;;  %v4824_v25 = vand.u32 4294901760, %v4807_v8 }
 0x1f6   : > { %597 = vrot.lane.b32.xlu0 %v4815_v10, %s4412_s13 }
 0x1f7   : > { %5876 = vst [vmem:[#allocation22_spill] sm:$0xff] %v4824_v25  ;;  %v4833_v27 = vsub.f32 %v677_v1, %v4821_v45  ;;  %v4835_v12 = vpop.trf.xlu0  ;;  %3824 = vmatprep.mubr.f32.mxu0 %v872_v57  ;;  %3980 = vmatprep.mubr.f32.mxu1 %v872_v57  ;;  %v881_v20 = vsub.f32 %v4807_v8, %v4824_v25 }
 0x1f8   : > { %v680_v47 = vsel %vm633_vm1, %v4835_v12, 0  ;;  %517 = vrot.lane.b32.xlu1 %v4828_v53, %s4411_s12 }
 0x1f9   : > { %v4843_v3 = vand.u32 4294901760, %v680_v47  ;;  %v882_v51 = vand.u32 4294901760, %v881_v20  ;;  %v4846_v49 = vand.u32 4294901760, %v4833_v27  ;;  %v4860_v20 = vmul.f32 %v4681_v9, %v4681_v9 }
 0x1fb   : > { %v4849_v1 = vsub.f32 %v680_v47, %v4843_v3  ;;  %3825 = vmatmul.mubr.f32.gmra.mrb[12].mxu0 %v882_v51  ;;  %3981 = vmatmul.mubr.f32.gmra.mrb[12].mxu1 %v882_v51  ;;  %v891_v57 = vsub.f32 %v4833_v27, %v4846_v49 }
 0x1fc   : > { %581 = vrot.lane.b32.xlu1 %v4828_v53, %s4412_s13 }
 0x1fd   : > { %v892_v25 = vand.u32 4294901760, %v891_v57  ;;  %v4856_v33 = vand.u32 4294901760, %v4849_v1  ;;  %v4872_v57 = vmul.f32 %v4699_v24, %v4699_v24 }
 0x1ff   : > { %3827 = vmatprep.mubr.f32.mxu0 %v892_v25  ;;  %3983 = vmatprep.mubr.f32.mxu1 %v892_v25  ;;  %v901_v47 = vsub.f32 %v4849_v1, %v4856_v33  ;;  %v4924_v25 = vmul.f32 %v4750_v39, %v4750_v39 }
 0x200   : > { %519 = vrot.lane.b32.xlu1 %v4860_v20, %s4411_s12 }
 0x201   : > { %v902_v51 = vand.u32 4294901760, %v901_v47  ;;  %v4940_v47 = vmul.f32 %v4767_v0, %v4767_v0 }
 0x203   : > { %3828 = vmatmul.mubr.f32.gmra.mrb[14].mxu0 %v902_v51  ;;  %3984 = vmatmul.mubr.f32.gmra.mrb[14].mxu1 %v902_v51 }
 0x204   : > { %583 = vrot.lane.b32.xlu1 %v4860_v20, %s4412_s13  ;;  %3832 = vmatprep.mubr.f32.mxu0 %v4586_v17 }
 0x205   : > { %3988 = vmatprep.mubr.f32.mxu1 %v4586_v17 }
 0x207   : > { %3833 = vmatmul.mubr.f32.vlgmr.msra.gmra.mrb[0].mxu0 %v4596_v14  ;;  %3989 = vmatmul.mubr.f32.vlgmr.msra.gmra.mrb[0].mxu1 %v4596_v14 }
 0x208   : > { %3857 = vmatpush3.msra.mxu0 %v4568_v62  ;;  %4013 = vmatpush3.msra.mxu1 %v4571_v63  ;;  %v4892_v62 = vmul.f32 %v4715_v4, %v4715_v4  ;;  %v4908_v63 = vmul.f32 %v4731_v55, %v4731_v55 }
 0x209   : > { %521 = vrot.lane.b32.xlu1 %v4872_v57, %s4411_s12  ;;  %3835 = vmatprep.mubr.f32.mxu0 %v4607_v26 }
 0x20a   : > { %3991 = vmatprep.mubr.f32.mxu1 %v4607_v26  ;;  %3882 = vmatprep.subr.mxu0 %v4558_v60 }
 0x20b   : > { %3836 = vmatmul.mubr.f32.gmra.mrb[2].mxu0 %v4622_v34  ;;  %3992 = vmatmul.mubr.f32.gmra.mrb[2].mxu1 %v4622_v34 }
 0x20c   : > { %3838 = vmatprep.mubr.f32.mxu0 %v4638_v40  ;;  %3994 = vmatprep.mubr.f32.mxu1 %v4638_v40 }
 0x20d   : > { %585 = vrot.lane.b32.xlu1 %v4872_v57, %s4412_s13  ;;  %4038 = vmatprep.subr.mxu1 %v4560_v61 }
 0x20f   : > { %3839 = vmatmul.mubr.f32.gmra.mrb[4].mxu0 %v4655_v48  ;;  %3995 = vmatmul.mubr.f32.gmra.mrb[4].mxu1 %v4655_v48 }
 0x210   : > { %3841 = vmatprep.mubr.f32.mxu0 %v4673_v56  ;;  %3997 = vmatprep.mubr.f32.mxu1 %v4673_v56 }
 0x211   : > { %523 = vrot.lane.b32.xlu1 %v4892_v62, %s4411_s12 }
 0x213   : > { %3842 = vmatmul.mubr.f32.gmra.mrb[6].mxu0 %v4689_v13  ;;  %3998 = vmatmul.mubr.f32.gmra.mrb[6].mxu1 %v4689_v13 }
 0x214   : > { %3844 = vmatprep.mubr.f32.mxu0 %v4707_v32  ;;  %4000 = vmatprep.mubr.f32.mxu1 %v4707_v32 }
 0x215   : > { %587 = vrot.lane.b32.xlu1 %v4892_v62, %s4412_s13 }
 0x217   : > { %3845 = vmatmul.mubr.f32.gmra.mrb[8].mxu0 %v4723_v46  ;;  %4001 = vmatmul.mubr.f32.gmra.mrb[8].mxu1 %v4723_v46 }
 0x218   : > { %3847 = vmatprep.mubr.f32.mxu0 %v4738_v11  ;;  %4003 = vmatprep.mubr.f32.mxu1 %v4738_v11 }
 0x219   : > { %525 = vrot.lane.b32.xlu1 %v4908_v63, %s4411_s12 }
 0x21b   : > { %3848 = vmatmul.mubr.f32.gmra.mrb[10].mxu0 %v4758_v58  ;;  %4004 = vmatmul.mubr.f32.gmra.mrb[10].mxu1 %v4758_v58 }
 0x21c   : > { %3850 = vmatprep.mubr.f32.mxu0 %v4775_v41  ;;  %4006 = vmatprep.mubr.f32.mxu1 %v4775_v41 }
 0x21d   : > { %589 = vrot.lane.b32.xlu1 %v4908_v63, %s4412_s13 }
 0x21f   : > { %3851 = vmatmul.mubr.f32.gmra.mrb[12].mxu0 %v4799_v44  ;;  %4007 = vmatmul.mubr.f32.gmra.mrb[12].mxu1 %v4799_v44 }
 0x220   : > { %3853 = vmatprep.mubr.f32.mxu0 %v4821_v45  ;;  %4009 = vmatprep.mubr.f32.mxu1 %v4821_v45 }
 0x221   : > { %527 = vrot.lane.b32.xlu1 %v4924_v25, %s4411_s12 }
 0x223   : > { %3854 = vmatmul.mubr.f32.gmra.mrb[14].mxu0 %v4843_v3  ;;  %4010 = vmatmul.mubr.f32.gmra.mrb[14].mxu1 %v4843_v3 }
 0x224   : > { %3858 = vmatprep.mubr.f32.mxu0 %v4591_v18  ;;  %4014 = vmatprep.mubr.f32.mxu1 %v4591_v18  ;;  %v4972_v18 = vmul.f32 %v4835_v12, %v4835_v12 }
 0x225   : > { %591 = vrot.lane.b32.xlu1 %v4924_v25, %s4412_s13 }
 0x227   : > { %3859 = vmatmul.mubr.f32.vlgmr.msra.gmra.mrb[0].mxu0 %v4602_v22  ;;  %4015 = vmatmul.mubr.f32.vlgmr.msra.gmra.mrb[0].mxu1 %v4602_v22 }
 0x228   : > { %3883 = vmatpush3.msra.mxu0 %v4558_v60  ;;  %4039 = vmatpush3.msra.mxu1 %v4560_v61 }
 0x229   : > { %529 = vrot.lane.b32.xlu1 %v4940_v47, %s4411_s12  ;;  %3861 = vmatprep.mubr.f32.mxu0 %v4615_v30 }
 0x22a   : > { %4017 = vmatprep.mubr.f32.mxu1 %v4615_v30  ;;  %3908 = vmatprep.subr.mxu0 %v4574_v5 }
 0x22b   : > { %3862 = vmatmul.mubr.f32.gmra.mrb[2].mxu0 %v4628_v37  ;;  %4018 = vmatmul.mubr.f32.gmra.mrb[2].mxu1 %v4628_v37 }
 0x22c   : > { %3864 = vmatprep.mubr.f32.mxu0 %v4647_v43  ;;  %4020 = vmatprep.mubr.f32.mxu1 %v4647_v43 }
 0x22d   : > { %593 = vrot.lane.b32.xlu1 %v4940_v47, %s4412_s13  ;;  %4064 = vmatprep.subr.mxu1 %v4577_v6 }
 0x22f   : > { %3865 = vmatmul.mubr.f32.gmra.mrb[4].mxu0 %v4663_v52  ;;  %4021 = vmatmul.mubr.f32.gmra.mrb[4].mxu1 %v4663_v52 }
 0x230   : > { %3867 = vmatprep.mubr.f32.mxu0 %v4679_v7  ;;  %4023 = vmatprep.mubr.f32.mxu1 %v4679_v7  ;;  %v506_v22 = vpop.permute.xlu0 %505 }
 0x231   : > { %531 = vrot.lane.b32.xlu1 %v4793_v2, %s4411_s12  ;;  %v553_v37 = vadd.f32 %v506_v22, %v4583_v15  ;;  %v5877_v15 = vmov 0  }
 0x233   : > { %3868 = vmatmul.mubr.f32.gmra.mrb[6].mxu0 %v4697_v23  ;;  %4024 = vmatmul.mubr.f32.gmra.mrb[6].mxu1 %v4697_v23  ;;  %v5878_v23 = vmov 3  }
 0x234   : > { %3870 = vmatprep.mubr.f32.mxu0 %v4713_v35  ;;  %4026 = vmatprep.mubr.f32.mxu1 %v4713_v35 }
 0x235   : > { %533 = vrot.lane.b32.xlu1 %v4815_v10, %s4411_s12 }
 0x237   : > { %3871 = vmatmul.mubr.f32.gmra.mrb[8].mxu0 %v4729_v54  ;;  %4027 = vmatmul.mubr.f32.gmra.mrb[8].mxu1 %v4729_v54 }
 0x238   : > { %3873 = vmatprep.mubr.f32.mxu0 %v4748_v31  ;;  %4029 = vmatprep.mubr.f32.mxu1 %v4748_v31  ;;  %v5882_v31 = vld [vmem:[#allocation14_spill] sm:$0xff] }
 0x239   : > { %535 = vrot.lane.b32.xlu1 %v4972_v18, %s4411_s12 }
 0x23b   : > { %v4980_v30 = vpop.permute.xlu1 %3178  ;;  %3874 = vmatmul.mubr.f32.gmra.mrb[10].mxu0 %v4765_v16  ;;  %4030 = vmatmul.mubr.f32.gmra.mrb[10].mxu1 %v4765_v16 }
 0x23c   : > { %3876 = vmatprep.mubr.f32.mxu0 %v4785_v38  ;;  %4032 = vmatprep.mubr.f32.mxu1 %v4785_v38  ;;  %v5884_v38 = vld [vmem:[#allocation17_spill] sm:$0xff] }
 0x23d   : > { %599 = vrot.lane.b32.xlu1 %v4972_v18, %s4412_s13 }
 0x23f   : > { %v570_v43 = vpop.permute.xlu1 %569  ;;  %3877 = vmatmul.mubr.f32.gmra.mrb[12].mxu0 %v4807_v8  ;;  %4033 = vmatmul.mubr.f32.gmra.mrb[12].mxu1 %v4807_v8  ;;  %v5885_v8 = vld [vmem:[#allocation20_spill] sm:$0xff] }
 0x240   : > { %v617_v52 = vadd.f32 %v570_v43, %v553_v37  ;;  %3879 = vmatprep.mubr.f32.mxu0 %v4833_v27  ;;  %4035 = vmatprep.mubr.f32.mxu1 %v4833_v27  ;;  %v5887_v37 = vld [vmem:[#allocation22_spill] sm:$0xff] }
 0x242   : > { %2997 = vperm.xlu1 %4328, %v617_v52   ;;  %2866 = vperm.xlu0 %4327, %v617_v52  }
 0x243   : > { %v4993_v7 = vpop.permute.xlu1 %3182  ;;  %3880 = vmatmul.mubr.f32.gmra.mrb[14].mxu0 %v4849_v1  ;;  %4036 = vmatmul.mubr.f32.gmra.mrb[14].mxu1 %v4849_v1  ;;  %v5886_v1 = vld [vmem:[#allocation11_spill] sm:$0xff] }
 0x244   : > { %3884 = vmatprep.mubr.f32.mxu0 %v4599_v21  ;;  %4040 = vmatprep.mubr.f32.mxu1 %v4599_v21 }
 0x246   : > { %4329 = vset.pattern.permute.xlu1 %v5877_v15  ;;  %4330 = vset.pattern.permute.xlu0 %v5878_v23 }
 0x247   : > { %v508_v35 = vpop.permute.xlu1 %507  ;;  %3885 = vmatmul.mubr.f32.vlgmr.msra.gmra.mrb[0].mxu0 %v4610_v28  ;;  %4041 = vmatmul.mubr.f32.vlgmr.msra.gmra.mrb[0].mxu1 %v4610_v28 }
 0x248   : > { %3909 = vmatpush3.msra.mxu0 %v4574_v5  ;;  %4065 = vmatpush3.msra.mxu1 %v4577_v6  ;;  %v554_v54 = vadd.f32 %v508_v35, %v4612_v29  ;;  %v5879_v29 = vld [vmem:[#allocation12_spill] sm:$0xff] }
 0x249   : > { %3887 = vmatprep.mubr.f32.mxu0 %v4625_v36  ;;  %4043 = vmatprep.mubr.f32.mxu1 %v4625_v36  ;;  %v5880_v36 = vld [vmem:[#allocation13_spill] sm:$0xff] }
 0x24a   : > { %3934 = vmatprep.subr.mxu0 %v4558_v60  ;;  %4090 = vmatprep.subr.mxu1 %v4560_v61 }
 0x24b   : > { %v572_v21 = vpop.permute.xlu1 %571  ;;  %3888 = vmatmul.mubr.f32.gmra.mrb[2].mxu0 %v4641_v42  ;;  %4044 = vmatmul.mubr.f32.gmra.mrb[2].mxu1 %v4641_v42  ;;  %v5881_v42 = vld [vmem:[#allocation9_spill] sm:$0xff] }
 0x24c   : > { %v618_v28 = vadd.f32 %v572_v21, %v554_v54  ;;  %3890 = vmatprep.mubr.f32.mxu0 %v4658_v50  ;;  %4046 = vmatprep.mubr.f32.mxu1 %v4658_v50 }
 0x24e   : > { %2871 = vperm.xlu1 %4329, %v618_v28   ;;  %3001 = vperm.xlu0 %4330, %v618_v28  }
 0x24f   : > { %v5014_v5 = vpop.permute.xlu1 %3186  ;;  %3891 = vmatmul.mubr.f32.gmra.mrb[4].mxu0 %v4676_v59  ;;  %4047 = vmatmul.mubr.f32.gmra.mrb[4].mxu1 %v4676_v59 }
 0x250   : > { %3893 = vmatprep.mubr.f32.mxu0 %v4692_v19  ;;  %4049 = vmatprep.mubr.f32.mxu1 %v4692_v19  ;;  %v5883_v19 = vld [vmem:[#allocation16_spill] sm:$0xff] }
 0x252   : > { %4332 = vset.pattern.permute.xlu0 %v5877_v15 }
 0x253   : > { %v510_v6 = vpop.permute.xlu1 %509  ;;  %3894 = vmatmul.mubr.f32.gmra.mrb[6].mxu0 %v5879_v29  ;;  %4050 = vmatmul.mubr.f32.gmra.mrb[6].mxu1 %v5879_v29 }
 0x254   : > { %3896 = vmatprep.mubr.f32.mxu0 %v5880_v36  ;;  %4052 = vmatprep.mubr.f32.mxu1 %v5880_v36  ;;  %v555_v50 = vadd.f32 %v510_v6, %v5881_v42 }
 0x257   : > { %v574_v27 = vpop.permute.xlu1 %573  ;;  %3897 = vmatmul.mubr.f32.gmra.mrb[8].mxu0 %v5882_v31  ;;  %4053 = vmatmul.mubr.f32.gmra.mrb[8].mxu1 %v5882_v31 }
 0x258   : > { %v619_v59 = vadd.f32 %v574_v27, %v555_v50  ;;  %3899 = vmatprep.mubr.f32.mxu0 %v5883_v19  ;;  %4055 = vmatprep.mubr.f32.mxu1 %v5883_v19 }
 0x25a   : > { %2876 = vperm.xlu1 %4329, %v619_v59  }
 0x25b   : > { %v512_v16 = vpop.permute.xlu1 %511  ;;  %3900 = vmatmul.mubr.f32.gmra.mrb[10].mxu0 %v5884_v38  ;;  %4056 = vmatmul.mubr.f32.gmra.mrb[10].mxu1 %v5884_v38 }
 0x25c   : > { %3902 = vmatprep.mubr.f32.mxu0 %v5885_v8  ;;  %4058 = vmatprep.mubr.f32.mxu1 %v5885_v8  ;;  %v556_v51 = vadd.f32 %v512_v16, %v5886_v1 }
 0x25e   : > { %4331 = vset.pattern.permute.xlu1 %v5878_v23 }
 0x25f   : > { %v576_v22 = vpop.permute.xlu1 %575  ;;  %3005 = vperm.xlu1 %4331, %v619_v59   ;;  %3903 = vmatmul.mubr.f32.gmra.mrb[12].mxu0 %v5887_v37 }
 0x260   : > { %v620_v43 = vadd.f32 %v576_v22, %v556_v51  ;;  %4059 = vmatmul.mubr.f32.gmra.mrb[12].mxu1 %v5887_v37  ;;  %3905 = vmatprep.mubr.f32.mxu0 %v4846_v49 }
 0x261   : > { %4061 = vmatprep.mubr.f32.mxu1 %v4846_v49 }
 0x262   : > { %2881 = vperm.xlu0 %4332, %v620_v43  }
 0x263   : > { %v5040_v52 = vpop.permute.xlu1 %3194  ;;  %3009 = vperm.xlu1 %4331, %v620_v43   ;;  %3906 = vmatmul.mubr.f32.gmra.mrb[14].mxu0 %v4856_v33 }
 0x264   : > { %4062 = vmatmul.mubr.f32.gmra.mrb[14].mxu1 %v4856_v33  ;;  %3910 = vmatprep.mubr.f32.mxu0 %v4586_v17  ;;  %v5888_v33 = vld [vmem:[#allocation15_spill] sm:$0xff] }
 0x265   : > { %4066 = vmatprep.mubr.f32.mxu1 %v4586_v17 }
 0x266   : > { %4334 = vset.pattern.permute.xlu0 %v5878_v23 }
 0x267   : > { %v514_v35 = vpop.permute.xlu1 %513  ;;  %3911 = vmatmul.mubr.f32.vlgmr.msra.gmra.mrb[0].mxu0 %v4596_v14  ;;  %4333 = vset.pattern.permute.xlu1 %v5877_v15 }
 0x268   : > { %3935 = vmatpush3.msra.mxu0 %v4558_v60  ;;  %4067 = vmatmul.mubr.f32.vlgmr.msra.gmra.mrb[0].mxu1 %v4596_v14  ;;  %v557_v49 = vadd.f32 %v514_v35, %v5888_v33 }
 0x269   : > { %4091 = vmatpush3.msra.mxu1 %v4560_v61  ;;  %3913 = vmatprep.mubr.f32.mxu0 %v4607_v26  ;;  %v5889_v61 = vld [vmem:[#allocation18_spill] sm:$0xff] }
 0x26a   : > { %4069 = vmatprep.mubr.f32.mxu1 %v4607_v26 }
 0x26b   : > { %v578_v54 = vpop.permute.xlu1 %577  ;;  %3914 = vmatmul.mubr.f32.gmra.mrb[2].mxu0 %v4622_v34 }
 0x26c   : > { %v621_v21 = vadd.f32 %v578_v54, %v557_v49  ;;  %4070 = vmatmul.mubr.f32.gmra.mrb[2].mxu1 %v4622_v34  ;;  %3916 = vmatprep.mubr.f32.mxu0 %v4638_v40  ;;  %v5890_v49 = vmov 6   ;;  %v5892_v54 = vld [vmem:[#allocation10_spill] sm:$0xff] }
 0x26d   : > { %4072 = vmatprep.mubr.f32.mxu1 %v4638_v40 }
 0x26e   : > { %2886 = vperm.xlu1 %4333, %v621_v21   ;;  %3013 = vperm.xlu0 %4334, %v621_v21  }
 0x26f   : > { %v516_v60 = vpop.permute.xlu1 %515  ;;  %3917 = vmatmul.mubr.f32.gmra.mrb[4].mxu0 %v4655_v48 }
 0x270   : > { %4073 = vmatmul.mubr.f32.gmra.mrb[4].mxu1 %v4655_v48  ;;  %3919 = vmatprep.mubr.f32.mxu0 %v4673_v56  ;;  %v558_v28 = vadd.f32 %v516_v60, %v5889_v61 }
 0x271   : > { %4075 = vmatprep.mubr.f32.mxu1 %v4673_v56 }
 0x272   : > { %4336 = vset.pattern.permute.xlu0 %v5877_v15 }
 0x273   : > { %v580_v6 = vpop.permute.xlu1 %579  ;;  %3920 = vmatmul.mubr.f32.gmra.mrb[6].mxu0 %v4689_v13 }
 0x274   : > { %v622_v29 = vadd.f32 %v580_v6, %v558_v28  ;;  %4076 = vmatmul.mubr.f32.gmra.mrb[6].mxu1 %v4689_v13  ;;  %3922 = vmatprep.mubr.f32.mxu0 %v4707_v32 }
 0x275   : > { %4078 = vmatprep.mubr.f32.mxu1 %v4707_v32 }
 0x276   : > { %2891 = vperm.xlu1 %4333, %v622_v29  }
 0x277   : > { %v518_v36 = vpop.permute.xlu1 %517  ;;  %3923 = vmatmul.mubr.f32.gmra.mrb[8].mxu0 %v4723_v46 }
 0x278   : > { %4079 = vmatmul.mubr.f32.gmra.mrb[8].mxu1 %v4723_v46  ;;  %3925 = vmatprep.mubr.f32.mxu0 %v4738_v11  ;;  %v559_v42 = vadd.f32 %v518_v36, %v4828_v53 }
 0x279   : > { %4081 = vmatprep.mubr.f32.mxu1 %v4738_v11 }
 0x27a   : > { %4335 = vset.pattern.permute.xlu1 %v5878_v23 }
 0x27b   : > { %v582_v50 = vpop.permute.xlu1 %581  ;;  %3017 = vperm.xlu1 %4335, %v622_v29   ;;  %3926 = vmatmul.mubr.f32.gmra.mrb[10].mxu0 %v4758_v58 }
 0x27c   : > { %v623_v27 = vadd.f32 %v582_v50, %v559_v42  ;;  %4082 = vmatmul.mubr.f32.gmra.mrb[10].mxu1 %v4758_v58  ;;  %3928 = vmatprep.mubr.f32.mxu0 %v4775_v41 }
 0x27d   : > { %4084 = vmatprep.mubr.f32.mxu1 %v4775_v41 }
 0x27e   : > { %2896 = vperm.xlu0 %4336, %v623_v27  }
 0x27f   : > { %v520_v31 = vpop.permute.xlu1 %519  ;;  %3021 = vperm.xlu1 %4335, %v623_v27   ;;  %3929 = vmatmul.mubr.f32.gmra.mrb[12].mxu0 %v4799_v44 }
 0x280   : > { %4085 = vmatmul.mubr.f32.gmra.mrb[12].mxu1 %v4799_v44  ;;  %3931 = vmatprep.mubr.f32.mxu0 %v4821_v45  ;;  %v560_v53 = vadd.f32 %v520_v31, %v4860_v20 }
 0x281   : > { %4087 = vmatprep.mubr.f32.mxu1 %v4821_v45 }
 0x282   : > { %4338 = vset.pattern.permute.xlu0 %v5878_v23 }
 0x283   : > { %v584_v59 = vpop.permute.xlu1 %583  ;;  %3932 = vmatmul.mubr.f32.gmra.mrb[14].mxu0 %v4843_v3  ;;  %4337 = vset.pattern.permute.xlu1 %v5877_v15 }
 0x284   : > { %v624_v19 = vadd.f32 %v584_v59, %v560_v53  ;;  %4088 = vmatmul.mubr.f32.gmra.mrb[14].mxu1 %v4843_v3  ;;  %3936 = vmatprep.mubr.f32.mxu0 %v4586_v17 }
 0x285   : > { %4092 = vmatprep.mubr.f32.mxu1 %v4586_v17 }
 0x286   : > { %2901 = vperm.xlu1 %4337, %v624_v19   ;;  %3025 = vperm.xlu0 %4338, %v624_v19  }
 0x287   : > { %v522_v16 = vpop.permute.xlu1 %521  ;;  %3937 = vmatmul.mubr.f32.vlgmr.msra.gmra.mrb[0].mxu0 %v4596_v14 }
 0x288   : > { %4093 = vmatmul.mubr.f32.vlgmr.msra.gmra.mrb[0].mxu1 %v4596_v14  ;;  %3939 = vmatprep.mubr.f32.mxu0 %v4607_v26  ;;  %v561_v20 = vadd.f32 %v522_v16, %v4872_v57 }
 0x289   : > { %4095 = vmatprep.mubr.f32.mxu1 %v4607_v26 }
 0x28a   : > { %4340 = vset.pattern.permute.xlu0 %v5877_v15 }
 0x28b   : > { %v586_v38 = vpop.permute.xlu1 %585  ;;  %3940 = vmatmul.mubr.f32.gmra.mrb[2].mxu0 %v4622_v34 }
 0x28c   : > { %v625_v8 = vadd.f32 %v586_v38, %v561_v20  ;;  %4096 = vmatmul.mubr.f32.gmra.mrb[2].mxu1 %v4622_v34  ;;  %3942 = vmatprep.mubr.f32.mxu0 %v4638_v40 }
 0x28d   : > { %4098 = vmatprep.mubr.f32.mxu1 %v4638_v40 }
 0x28e   : > { %2906 = vperm.xlu1 %4337, %v625_v8  }
 0x28f   : > { %v524_v17 = vpop.permute.xlu1 %523  ;;  %3943 = vmatmul.mubr.f32.gmra.mrb[4].mxu0 %v4655_v48 }
 0x290   : > { %4099 = vmatmul.mubr.f32.gmra.mrb[4].mxu1 %v4655_v48  ;;  %3945 = vmatprep.mubr.f32.mxu0 %v4673_v56  ;;  %v562_v14 = vadd.f32 %v524_v17, %v4892_v62 }
 0x291   : > { %4101 = vmatprep.mubr.f32.mxu1 %v4673_v56 }
 0x292   : > { %4339 = vset.pattern.permute.xlu1 %v5878_v23 }
 0x293   : > { %v588_v26 = vpop.permute.xlu1 %587  ;;  %3029 = vperm.xlu1 %4339, %v625_v8   ;;  %3946 = vmatmul.mubr.f32.gmra.mrb[6].mxu0 %v4689_v13  ;;  %v5895_v8 = vld [vmem:[#allocation6_spill] sm:$0xff] }
 0x294   : > { %v626_v34 = vadd.f32 %v588_v26, %v562_v14  ;;  %4102 = vmatmul.mubr.f32.gmra.mrb[6].mxu1 %v4689_v13  ;;  %3948 = vmatprep.mubr.f32.mxu0 %v4707_v32  ;;  %v455_v17 = vmul.f32 %v5895_v8, %v5895_v8 }
 0x295   : > { %4104 = vmatprep.mubr.f32.mxu1 %v4707_v32 }
 0x296   : > { %2911 = vperm.xlu0 %4340, %v626_v34  }
 0x297   : > { %v526_v40 = vpop.permute.xlu1 %525  ;;  %3033 = vperm.xlu1 %4339, %v626_v34   ;;  %3949 = vmatmul.mubr.f32.gmra.mrb[8].mxu0 %v4723_v46  ;;  %v457_v34 = vrot.slane %v455_v17, 1 }
 0x298   : > { %4105 = vmatmul.mubr.f32.gmra.mrb[8].mxu1 %v4723_v46  ;;  %3951 = vmatprep.mubr.f32.mxu0 %v4738_v11  ;;  %v563_v48 = vadd.f32 %v526_v40, %v4908_v63 }
 0x299   : > { %4107 = vmatprep.mubr.f32.mxu1 %v4738_v11 }
 0x29a   : > { %4342 = vset.pattern.permute.xlu0 %v5878_v23 }
 0x29b   : > { %v590_v56 = vpop.permute.xlu1 %589  ;;  %3952 = vmatmul.mubr.f32.gmra.mrb[10].mxu0 %v4758_v58  ;;  %4341 = vset.pattern.permute.xlu1 %v5877_v15 }
 0x29c   : > { %v627_v13 = vadd.f32 %v590_v56, %v563_v48  ;;  %4108 = vmatmul.mubr.f32.gmra.mrb[10].mxu1 %v4758_v58  ;;  %3954 = vmatprep.mubr.f32.mxu0 %v4775_v41  ;;  %v459_v48 = vadd.f32 %v457_v34, %v455_v17  ;;  %v460_v56 = vrot.slane %v455_v17, 2 }
 0x29d   : > { %4110 = vmatprep.mubr.f32.mxu1 %v4775_v41 }
 0x29e   : > { %2916 = vperm.xlu1 %4341, %v627_v13   ;;  %3037 = vperm.xlu0 %4342, %v627_v13  }
 0x29f   : > { %v528_v32 = vpop.permute.xlu1 %527  ;;  %3955 = vmatmul.mubr.f32.gmra.mrb[12].mxu0 %v4799_v44 }
 0x2a0   : > { %4111 = vmatmul.mubr.f32.gmra.mrb[12].mxu1 %v4799_v44  ;;  %3957 = vmatprep.mubr.f32.mxu0 %v4821_v45  ;;  %v564_v46 = vadd.f32 %v528_v32, %v4924_v25  ;;  %v5131_v44 = vpop.permute.xlu0 %3190 }
 0x2a1   : > { %4113 = vmatprep.mubr.f32.mxu1 %v4821_v45 }
 0x2a2   : > { %4344 = vset.pattern.permute.xlu0 %v5877_v15 }
 0x2a3   : > { %v592_v11 = vpop.permute.xlu1 %591  ;;  %3958 = vmatmul.mubr.f32.gmra.mrb[14].mxu0 %v4843_v3 }
 0x2a4   : > { %v628_v58 = vadd.f32 %v592_v11, %v564_v46  ;;  %4114 = vmatmul.mubr.f32.gmra.mrb[14].mxu1 %v4843_v3  ;;  %v596_v63 = vpop.permute.xlu0 %595  ;;  %v5896_v46 = vld [vmem:[#allocation5_spill] sm:$0xff] }
 0x2a5   : > { %v3062_v11 = vsub.s32 3, %v5896_v46  ;;  %v5291_v34 = vadd.s32 88, %v5896_v46 }
 0x2a6   : > { %2921 = vperm.xlu1 %4341, %v628_v58  }
 0x2a7   : > { %v530_v41 = vpop.permute.xlu1 %529  ;;  %5900 = vst [vmem:[#allocation12_spill] sm:$0xff] %v5291_v34 }
 0x2a8   : > { %v565_v57 = vadd.f32 %v530_v41, %v4940_v47  ;;  %v598_v22 = vpop.permute.xlu0 %597 }
 0x2aa   : > { %4343 = vset.pattern.permute.xlu1 %v5878_v23 }
 0x2ab   : > { %v594_v62 = vpop.permute.xlu1 %593  ;;  %3041 = vperm.xlu1 %4343, %v628_v58   ;;  %v462_v58 = vadd.f32 %v460_v56, %v459_v48 }
 0x2ac   : > { %v629_v45 = vadd.f32 %v594_v62, %v565_v57  ;;  %v5897_v62 = vsub.s32 0, %v5896_v46 }
 0x2ad   : > { %v5182_v57 = vrot.slane %v462_v58, %v3062_v11  ;;  %v5311_v11 = vadd.s32 96, %v5896_v46 }
 0x2ae   : > { %2926 = vperm.xlu0 %4344, %v629_v45  }
 0x2af   : > { %v532_v25 = vpop.permute.xlu1 %531  ;;  %3045 = vperm.xlu1 %4343, %v629_v45   ;;  %v5186_v45 = vrot.slane %v462_v58, %v5897_v62  ;;  %5902 = vst [vmem:[#allocation9_spill] sm:$0xff] %v5311_v11 }
 0x2b0   : > { %v566_v1 = vadd.f32 %v532_v25, %v4793_v2  ;;  %v5898_v25 = vld [vmem:[#allocation7_spill] sm:$0xff] }
 0x2b2   : > { %v630_v51 = vadd.f32 %v596_v63, %v566_v1  ;;  %4346 = vset.pattern.permute.xlu0 %v5878_v23  ;;  %v5192_v1 = vmul.f32 %v4980_v30, %v5898_v25  ;;  %v5899_v30 = vlaneseq }
 0x2b3   : > { %v534_v3 = vpop.permute.xlu1 %533  ;;  %4345 = vset.pattern.permute.xlu1 %v5877_v15 }
 0x2b4   : > { %v567_v47 = vadd.f32 %v534_v3, %v4815_v10  ;;  %3049 = vperm.xlu0 %4346, %v630_v51   ;;  %2931 = vperm.xlu1 %4345, %v630_v51   ;;  %v5891_v10 = vld [vmem:[#allocation8_spill] sm:$0xff]  ;;  %v5196_v51 = vmul.f32 %v4993_v7, %v5898_v25  ;;  %v5200_v3 = vmul.f32 %v5131_v44, %v5898_v25 }
 0x2b6   : > { %v631_v37 = vadd.f32 %v598_v22, %v567_v47  ;;  %v5204_v47 = vmul.f32 %v5014_v5, %v5898_v25  ;;  %v5208_v22 = vmul.f32 %v5040_v52, %v5898_v25 }
 0x2b7   : > { %v536_v43 = vpop.permute.xlu1 %535 }
 0x2b8   : > { %4347 = vset.pattern.permute.xlu0 %v5877_v15  ;;  %4348 = vset.pattern.permute.xlu1 %v5878_v23  ;;  %v568_v2 = vadd.f32 %v536_v43, %v4972_v18  ;;  %v5893_v18 = vld [vmem:[#allocation19_spill] sm:$0xff]  ;;  %v5894_v15 = vld [vmem:[#allocation21_spill] sm:$0xff]  ;;  %v5214_v43 = vand.u32 127, %v5899_v30 }
 0x2b9   : > { %3053 = vperm.xlu1 %4348, %v631_v37   ;;  %2936 = vperm.xlu0 %4347, %v631_v37   ;;  %v5211_v37 = vadd.s32 8, %v5896_v46 }
 0x2ba   : > { %vm3129_vm3 = vcmp.gt.s32.totalorder %v5214_v43, %v5896_v46 }
 0x2bb   : > { %v600_v35 = vpop.permute.xlu1 %599  ;;  %vm3130_vm2 = vcmp.gt.s32.totalorder %v5214_v43, %v5211_v37 }
 0x2bc   : > { %v632_v33 = vadd.f32 %v600_v35, %v568_v2 }
 0x2be   : > { %3057 = vperm.xlu1 %4348, %v632_v33   ;;  %2941 = vperm.xlu0 %4347, %v632_v33  }
 0x2c1   : > { %v2998_v23 = vpop.permute.xlu1 %2997 }
 0x2c2   : > { %4349 = vset.pattern.permute.xlu1 %v5890_v49  ;;  %4350 = vset.pattern.permute.xlu0 %v5890_v49  ;;  %v3064_v7 = vadd.f32 %v5182_v57, %v2998_v23  ;;  %v5241_v23 = vadd.s32 40, %v5896_v46 }
 0x2c3   : > { %3198 = vperm.xlu1 %4349, %v5891_v10   ;;  %3202 = vperm.xlu0 %4350, %v5892_v54  }
 0x2c4   : > { %vm3134_vm10 = vcmp.gt.s32.totalorder %v5214_v43, %v5241_v23 }
 0x2c7   : > { %3206 = vperm.xlu1 %4349, %v4681_v9   ;;  %3210 = vperm.xlu0 %4350, %v4699_v24  }
 0x2cb   : > { %3214 = vperm.xlu1 %4349, %v4715_v4   ;;  %3218 = vperm.xlu0 %4350, %v4731_v55  }
 0x2cd   : > { %v2872_v21 = vpop.permute.xlu1 %2871 }
 0x2ce   : > { %v2949_v44 = vadd.f32 %v5186_v45, %v2872_v21  ;;  %v5244_v21 = vadd.s32 32, %v5896_v46 }
 0x2cf   : > { %3222 = vperm.xlu1 %4349, %v4750_v39   ;;  %3226 = vperm.xlu0 %4350, %v4767_v0   ;;  %v2867_v39 = vpop.permute.xlu0 %2866 }
 0x2d0   : > { %v2948_v2 = vadd.f32 %v5186_v45, %v2867_v39  ;;  %v5258_v39 = vadd.s32 56, %v5896_v46  ;;  %vm3133_vm13 = vcmp.gt.s32.totalorder %v5214_v43, %v5244_v21 }
 0x2d3   : > { %3230 = vperm.xlu1 %4349, %v5893_v18   ;;  %3234 = vperm.xlu0 %4350, %v5894_v15   ;;  %v3002_v36 = vpop.permute.xlu0 %3001  ;;  %v5235_v18 = vadd.s32 24, %v5896_v46  ;;  %v5238_v15 = vadd.s32 16, %v5896_v46 }
 0x2d4   : > { %v3065_v35 = vadd.f32 %v5182_v57, %v3002_v36 }
 0x2d5   : > { %vm3132_vm4 = vcmp.gt.s32.totalorder %v5214_v43, %v5235_v18  ;;  %vm3131_vm6 = vcmp.gt.s32.totalorder %v5214_v43, %v5238_v15 }
 0x2d7   : > { %3238 = vperm.xlu1 %4349, %v4835_v12  }
 0x2d9   : > { %v2877_v60 = vpop.permute.xlu1 %2876 }
 0x2da   : > { %v5223_v33 = vadd.f32 %v5186_v45, %v2877_v60 }
 0x2de   : > { %v3006_v9 = vpop.permute.xlu1 %3005 }
 0x2df   : > { %v5226_v52 = vadd.f32 %v5182_v57, %v3006_v9 }
 0x2e1   : > { %v2882_v42 = vpop.permute.xlu0 %2881 }
 0x2e2   : > { %v3010_v61 = vpop.permute.xlu1 %3009  ;;  %v2951_v49 = vadd.f32 %v5186_v45, %v2882_v42 }
 0x2e3   : > { %v5230_v10 = vadd.f32 %v5182_v57, %v3010_v61 }
 0x2ed   : > { %v2887_v24 = vpop.permute.xlu1 %2886  ;;  %v3014_v12 = vpop.permute.xlu0 %3013 }
 0x2ee   : > { %v5247_v60 = vadd.f32 %v5186_v45, %v2887_v24  ;;  %v5250_v9 = vadd.f32 %v5182_v57, %v3014_v12 }
 0x2f5   : > { %v2892_v28 = vpop.permute.xlu1 %2891 }
 0x2f6   : > { %v5253_v61 = vadd.f32 %v5186_v45, %v2892_v28  ;;  %v5272_v28 = vadd.s32 48, %v5896_v46 }
 0x2fa   : > { %v3018_v4 = vpop.permute.xlu1 %3017 }
 0x2fb   : > { %v5261_v36 = vadd.f32 %v5182_v57, %v3018_v4  ;;  %v5281_v4 = vadd.s32 72, %v5896_v46 }
 0x2fd   : > { %v2897_v31 = vpop.permute.xlu0 %2896 }
 0x2fe   : > { %v3022_v6 = vpop.permute.xlu1 %3021  ;;  %v5264_v42 = vadd.f32 %v5186_v45, %v2897_v31  ;;  %v5284_v31 = vadd.s32 64, %v5896_v46 }
 0x2ff   : > { %v5267_v24 = vadd.f32 %v5182_v57, %v3022_v6 }
 0x305   : > { %v2902_v55 = vpop.permute.xlu1 %2901  ;;  %v3026_v59 = vpop.permute.xlu0 %3025 }
 0x306   : > { %v5275_v12 = vadd.f32 %v5186_v45, %v2902_v55  ;;  %v5278_v8 = vadd.f32 %v5182_v57, %v3026_v59  ;;  %v5294_v55 = vadd.s32 80, %v5896_v46  ;;  %v5297_v59 = vadd.s32 104, %v5896_v46 }
 0x308   : > { %5901 = vst [vmem:[#allocation13_spill] sm:$0xff] %v5297_v59 }
 0x30d   : > { %v5153_v29 = vpop.permute.xlu1 %2906 }
 0x30e   : > { %v5288_v6 = vadd.f32 %v5186_v45, %v5153_v29 }
 0x312   : > { %v5155_v0 = vpop.permute.xlu1 %3029 }
 0x313   : > { %v5301_v48 = vadd.f32 %v5182_v57, %v5155_v0 }
 0x315   : > { %v2912_v16 = vpop.permute.xlu0 %2911 }
 0x316   : > { %v5157_v50 = vpop.permute.xlu1 %3033  ;;  %v5304_v56 = vadd.f32 %v5186_v45, %v2912_v16  ;;  %v5323_v16 = vadd.s32 112, %v5896_v46 }
 0x317   : > { %v5308_v29 = vadd.f32 %v5182_v57, %v5157_v50  ;;  %v5326_v50 = vadd.s32 120, %v5896_v46 }
 0x318   : > { %5905 = vst [vmem:[#allocation17_spill] sm:$0xff] %v5323_v16 }
 0x319   : > { %5906 = vst [vmem:[#allocation20_spill] sm:$0xff] %v5326_v50 }
 0x31d   : > { %v5159_v27 = vpop.permute.xlu1 %2916  ;;  %v3038_v20 = vpop.permute.xlu0 %3037 }
 0x31e   : > { %v5315_v58 = vadd.f32 %v5186_v45, %v5159_v27  ;;  %v5318_v62 = vadd.f32 %v5182_v57, %v3038_v20 }
 0x320   : > { %5903 = vst [vmem:[#allocation14_spill] sm:$0xff] %v5315_v58  ;;  %5904 = vst [vmem:[#allocation16_spill] sm:$0xff] %v5318_v62 }
 0x325   : > { %v5161_v53 = vpop.permute.xlu1 %2921 }
 0x326   : > { %v5330_v59 = vadd.f32 %v5186_v45, %v5161_v53 }
 0x328   : > { %5907 = vst [vmem:[#allocation11_spill] sm:$0xff] %v5330_v59 }
 0x32a   : > { %v5163_v19 = vpop.permute.xlu1 %3041 }
 0x32b   : > { %v5334_v27 = vadd.f32 %v5182_v57, %v5163_v19 }
 0x32d   : > { %v5169_v14 = vpop.permute.xlu0 %2926 }
 0x32e   : > { %v5165_v38 = vpop.permute.xlu1 %3045  ;;  %v5338_v20 = vadd.f32 %v5186_v45, %v5169_v14 }
 0x32f   : > { %v5342_v16 = vadd.f32 %v5182_v57, %v5165_v38 }
 0x330   : > { %5908 = vst [vmem:[#allocation22_spill] sm:$0xff] %v5338_v20 }
 0x331   : > { %5909 = vst [vmem:[#allocation15_spill] sm:$0xff] %v5342_v16 }
 0x333   : > { %v5171_v26 = vpop.permute.xlu1 %2931  ;;  %v5173_v40 = vpop.permute.xlu0 %3049 }
 0x334   : > { %v5346_v50 = vadd.f32 %v5186_v45, %v5171_v26  ;;  %v5350_v19 = vadd.f32 %v5182_v57, %v5173_v40 }
 0x336   : > { %5910 = vst [vmem:[#allocation18_spill] sm:$0xff] %v5350_v19 }
 0x338   : > { %v5175_v13 = vpop.permute.xlu1 %3053  ;;  %v5177_v32 = vpop.permute.xlu0 %2936 }
 0x339   : > { %v5354_v14 = vadd.f32 %v5182_v57, %v5175_v13  ;;  %v5358_v38 = vadd.f32 %v5186_v45, %v5177_v32 }
 0x33b   : > { %5911 = vst [vmem:[#allocation8_spill] sm:$0xff] %v5354_v14  ;;  %5912 = vst [vmem:[#allocation10_spill] sm:$0xff] %v5358_v38 }
 0x33d   : > { %v5180_v41 = vpop.permute.xlu1 %3057  ;;  %v5188_v63 = vpop.permute.xlu0 %2941 }
 0x33e   : > { %v5362_v26 = vadd.f32 %v5182_v57, %v5180_v41  ;;  %v5366_v40 = vadd.f32 %v5186_v45, %v5188_v63 }
 0x340   : > { %5913 = vst [vmem:[#allocation19_spill] sm:$0xff] %v5362_v26  ;;  %5914 = vst [vmem:[#allocation21_spill] sm:$0xff] %v5366_v40 }
 0x342   : > { %v5220_v5 = vpop.permute.xlu1 %3198  ;;  %v5232_v54 = vpop.permute.xlu0 %3202 }
 0x346   : > { %v3207_v17 = vpop.permute.xlu1 %3206  ;;  %v3211_v30 = vpop.permute.xlu0 %3210 }
 0x34a   : > { %v3219_v63 = vpop.permute.xlu0 %3218 }
 0x35a   : > { %v3938_v0 = vpop.f32.mrb[0].mxu0 }
 0x35b   : > { %v2965_v62 = vadd.f32 %v3938_v0, %v2949_v44  ;;  %v4094_v11 = vpop.f32.mrb[0].mxu1  ;;  %v1679_v58 = vpop.f32.mrb[1].mxu0 }
 0x35c   : > { %v3081_v53 = vadd.f32 %v4094_v11, %v3065_v35  ;;  %v2964_v34 = vadd.f32 %v2948_v2, %v1679_v58  ;;  %v2770_v59 = vpop.f32.mrb[1].mxu1  ;;  %v3215_v2 = vpop.permute.xlu1 %3214 }
 0x35d   : > { %v2981_v44 = vmax.f32 %v2965_v62, 0.0  ;;  %v3080_v0 = vadd.f32 %v3064_v7, %v2770_v59 }
 0x35e   : > { %v3097_v35 = vmax.f32 %v3081_v53, 0.0  ;;  %v2980_v11 = vmax.f32 %v2964_v34, 0.0  ;;  %v3941_v58 = vpop.f32.mrb[2].mxu0 }
 0x35f   : > { %vm3146_vm5 = vcmp.lt.f32.partialorder %v2981_v44, 36.0  ;;  %v3096_v13 = vmax.f32 %v3080_v0, 0.0  ;;  %v2967_v62 = vadd.f32 %v3941_v58, %v2951_v49  ;;  %v4097_v7 = vpop.f32.mrb[2].mxu1  ;;  %v1691_v59 = vpop.f32.mrb[3].mxu0  ;;  %v5401_v0 = vmul.f32 %v3211_v30, %v5898_v25 }
 0x360   : > { %vm3162_vm7 = vmand %vm3130_vm2, %vm3146_vm5  ;;  %v5373_v32 = vmul.f32 %v3097_v35, %v2981_v44  ;;  %v5375_v41 = vadd.f32 %v3097_v35, %v2981_v44  ;;  %vm3145_vm8 = vcmp.lt.f32.partialorder %v2980_v11, 36.0  ;;  %v3083_v57 = vadd.f32 %v4097_v7, %v5230_v10  ;;  %v2782_v45 = vpop.f32.mrb[3].mxu1 }
 0x361   : > { %v5379_v49 = vsel %vm3162_vm7, %v5196_v51, 0.0  ;;  %vm3161_vm9 = vmand %vm3129_vm3, %vm3145_vm8  ;;  %v5384_v34 = vmul.f32 %v3096_v13, %v2980_v11  ;;  %v5386_v37 = vadd.f32 %v3096_v13, %v2980_v11  ;;  %v2983_v53 = vmax.f32 %v2967_v62, 0.0 }
 0x362   : > { %v5390_v44 = vmul.f32 %v5220_v5, %v5898_v25  ;;  %v5394_v10 = vmul.f32 %v5232_v54, %v5898_v25  ;;  %v5397_v51 = vmul.f32 %v3207_v17, %v5898_v25  ;;  %4351 = vrsqrt.f32 %v5373_v32  ;;  %v3944_v46 = vpop.f32.mrb[4].mxu0 }
 0x363   : > { %v5404_v35 = vmul.f32 %v3215_v2, %v5898_v25  ;;  %v5407_v11 = vsel %vm3161_vm9, %v5192_v1, 0.0  ;;  %4353 = vrsqrt.f32 %v5384_v34  ;;  %v4100_v5 = vpop.f32.mrb[4].mxu1  ;;  %v1703_v54 = vpop.f32.mrb[5].mxu0  ;;  %v5413_v17 = vmul.f32 %v3219_v63, %v5898_v25 }
 0x364   : > { %v3491_v30 = vadd.f32 %v5379_v49, %v5407_v11  ;;  %vm3148_vm11 = vcmp.lt.f32.partialorder %v2983_v53, 36.0  ;;  %v3099_v58 = vmax.f32 %v3083_v57, 0.0  ;;  %v2794_v1 = vpop.f32.mrb[5].mxu1  ;;  %v3223_v2 = vpop.permute.xlu1 %3222  ;;  %v2966_v13 = vadd.f32 %v5223_v33, %v1691_v59 }
 0x365   : > { %vm3164_vm14 = vmand %vm3132_vm4, %vm3148_vm11  ;;  %v3082_v62 = vadd.f32 %v5226_v52, %v2782_v45  ;;  %v2969_v7 = vadd.f32 %v3944_v46, %v5253_v61  ;;  %v3085_v63 = vadd.f32 %v4100_v5, %v5261_v36  ;;  %v2968_v26 = vadd.f32 %v5247_v60, %v1703_v54 }
 0x366   : > { %v5427_v14 = vsel %vm3164_vm14, %v5200_v3, 0.0  ;;  %v5429_v57 = vmul.f32 %v3099_v58, %v2983_v53  ;;  %v5431_v38 = vadd.f32 %v3099_v58, %v2983_v53  ;;  %v3947_v40 = vpop.f32.mrb[6].mxu0  ;;  %v2982_v18 = vmax.f32 %v2966_v13, 0.0 }
 0x367   : > { %v3098_v16 = vmax.f32 %v3082_v62, 0.0  ;;  %v2985_v20 = vmax.f32 %v2969_v7, 0.0  ;;  %v3101_v33 = vmax.f32 %v3085_v63, 0.0  ;;  %v4103_v59 = vpop.f32.mrb[6].mxu1  ;;  %v1715_v52 = vpop.f32.mrb[7].mxu0  ;;  %v5435_v61 = vmul.f32 %v3223_v2, %v5898_v25 }
 0x368   : > { %vm3298_vm15 = vcmp.eq.f32.partialorder %v5373_v32, inf  ;;  %vm3300_vm0 = vcmp.eq.f32.partialorder %v5373_v32, 0.0  ;;  %4355 = vrsqrt.f32 %v5429_v57  ;;  %v5440_v3 = vpop.f32.mrb[7].mxu1  ;;  %v3301_v60 = vand.u32 2147483648, %v5373_v32 }
 0x369   : > { %5915 = vst [vmem:[#allocation23_spill] sm:$0xff] %v5435_v61  ;;  %vm3147_vm1 = vcmp.lt.f32.partialorder %v2982_v18, 36.0  ;;  %v5443_v36 = vmul.f32 %v3098_v16, %v2982_v18  ;;  %v5445_v45 = vadd.f32 %v3098_v16, %v2982_v18  ;;  %v5450_v53 = vmul.f32 %v3101_v33, %v2985_v20 }
 0x36a   : > { %vm3163_vm2 = vmand %vm3131_vm6, %vm3147_vm1  ;;  %v5452_v46 = vadd.f32 %v3101_v33, %v2985_v20  ;;  %v2984_v5 = vmax.f32 %v2968_v26, 0.0  ;;  %v3084_v54 = vadd.f32 %v5250_v9, %v2794_v1  ;;  %v5455_v58 = vpop.f32.mrb[8].mxu0  ;;  %vm3291_vm3 = vcmp.eq.f32.partialorder %v5384_v34, inf }
 0x36b   : > { %v5459_v2 = vsel %vm3163_vm2, %v5204_v47, 0.0  ;;  %4357 = vrsqrt.f32 %v5443_v36  ;;  %vm3150_vm4 = vcmp.lt.f32.partialorder %v2985_v20, 36.0  ;;  %v5462_v16 = vpop.f32.mrb[8].mxu1  ;;  %v5464_v15 = vpop.f32.mrb[9].mxu0  ;;  %vm3293_vm5 = vcmp.eq.f32.partialorder %v5384_v34, 0.0 }
 0x36c   : > { %v4352_v13 = vpop.eup %4351  ;;  %v3294_v26 = vand.u32 2147483648, %v5384_v34  ;;  %v3492_v9 = vadd.f32 %v3491_v30, %v5459_v2  ;;  %4359 = vrsqrt.f32 %v5450_v53  ;;  %v5470_v1 = vpop.f32.mrb[9].mxu1  ;;  %vm3312_vm6 = vcmp.eq.f32.partialorder %v5429_v57, inf  ;;  %vm5481_vm8 = vmand %vm3134_vm10, %vm3150_vm4 }
 0x36d   : > { %v4354_v47 = vpop.eup %4353  ;;  %v3297_v62 = vmul.f32 %v4352_v13, %v5373_v32  ;;  %vm3314_vm7 = vcmp.eq.f32.partialorder %v5429_v57, 0.0  ;;  %v3315_v7 = vand.u32 2147483648, %v5429_v57  ;;  %vm3149_vm9 = vcmp.lt.f32.partialorder %v2984_v5, 36.0 }
 0x36e   : > { %v3290_v63 = vmul.f32 %v4354_v47, %v5384_v34  ;;  %v3493_v18 = vadd.f32 %v3492_v9, %v5427_v14  ;;  %v3100_v33 = vmax.f32 %v3084_v54, 0.0  ;;  %v5486_v13 = vpop.f32.mrb[10].mxu0  ;;  %vm3305_vm11 = vcmp.eq.f32.partialorder %v5443_v36, inf  ;;  %vm3165_vm14 = vmand %vm3133_vm13, %vm3149_vm9 }
 0x36f   : > { %v3299_v61 = vsel %vm3298_vm15, %v5373_v32, %v3297_v62  ;;  %v2971_v23 = vadd.f32 %v3947_v40, %v5275_v12  ;;  %v3087_v20 = vadd.f32 %v4103_v59, %v5278_v8  ;;  %v2970_v47 = vadd.f32 %v5264_v42, %v1715_v52  ;;  %v5498_v9 = vpop.f32.mrb[10].mxu1  ;;  %v5500_v54 = vpop.f32.mrb[11].mxu0 }
 0x370   : > { %v3302_v19 = vsel %vm3300_vm0, %v3301_v60, %v3299_v61  ;;  %v3292_v62 = vsel %vm3291_vm3, %v5384_v34, %v3290_v63  ;;  %vm3307_vm10 = vcmp.eq.f32.partialorder %v5443_v36, 0.0  ;;  %v5509_v21 = vsel %vm3165_vm14, %v5208_v22, 0.0  ;;  %v5515_v42 = vpop.f32.mrb[11].mxu1 }
 0x371   : > { %v5511_v12 = vmul.f32 %v3100_v33, %v2984_v5  ;;  %vm3135_vm13 = vcmp.gt.s32.totalorder %v5214_v43, %v5272_v28  ;;  %v3418_v8 = vadd.f32 %v3302_v19, %v3302_v19  ;;  %v3295_v40 = vsel %vm3293_vm5, %v3294_v26, %v3292_v62 }
 0x372   : > { %v3494_v32 = vadd.f32 %v3493_v18, %v5509_v21  ;;  %v5520_v59 = vadd.f32 %v3100_v33, %v2984_v5  ;;  %v4356_v52 = vpop.eup %4355  ;;  %v3417_v61 = vadd.f32 %v3295_v40, %v3295_v40  ;;  %v3308_v22 = vand.u32 2147483648, %v5443_v36  ;;  %v5529_v63 = vpop.f32.mrb[12].mxu0 }
 0x373   : > { %v5526_v60 = vsel %vm5481_vm8, %v5390_v44, 0.0  ;;  %4361 = vrsqrt.f32 %v5511_v12  ;;  %v3434_v19 = vsub.f32 %v5375_v41, %v3418_v8  ;;  %v3311_v34 = vmul.f32 %v4356_v52, %v5429_v57  ;;  %v5536_v26 = vpop.f32.mrb[12].mxu1  ;;  %v5538_v18 = vpop.f32.mrb[13].mxu0 }
 0x374   : > { %vm3326_vm15 = vcmp.eq.f32.partialorder %v5450_v53, inf  ;;  %v2987_v5 = vmax.f32 %v2971_v23, 0.0  ;;  %vm3136_vm0 = vcmp.gt.s32.totalorder %v5214_v43, %v5258_v39  ;;  %5918 = vst [vmem:[#allocation24_spill] sm:$0xff] %v5536_v26  ;;  %5919 = vst [vmem:[#allocation25_spill] sm:$0xff] %v5538_v18  ;;  %v3433_v44 = vsub.f32 %v5386_v37, %v3417_v61  ;;  %v5543_v41 = vpop.f32.mrb[13].mxu1 }
 0x375   : > { %vm3328_vm1 = vcmp.eq.f32.partialorder %v5450_v53, 0.0  ;;  %v3103_v30 = vmax.f32 %v3087_v20, 0.0  ;;  %v3495_v33 = vadd.f32 %v3494_v32, %v5526_v60  ;;  %5920 = vst [vmem:[#allocation26_spill] sm:$0xff] %v5543_v41  ;;  %v4358_v62 = vpop.eup %4357  ;;  %v3450_v8 = vmul.f32 %v3434_v19, %v5379_v49 }
 0x376   : > { %v3313_v23 = vsel %vm3312_vm6, %v5429_v57, %v3311_v34  ;;  %v3329_v40 = vand.u32 2147483648, %v5450_v53  ;;  %v2986_v52 = vmax.f32 %v2970_v47, 0.0  ;;  %v4360_v18 = vpop.eup %4359  ;;  %v3449_v37 = vmul.f32 %v3433_v44, %v5407_v11  ;;  %v5556_v41 = vpop.f32.mrb[14].mxu0 }
 0x377   : > { %v3316_v20 = vsel %vm3314_vm7, %v3315_v7, %v3313_v23  ;;  %v3304_v32 = vmul.f32 %v4358_v62, %v5443_v36  ;;  %v5554_v61 = vmul.f32 %v3103_v30, %v2987_v5  ;;  %v3325_v19 = vmul.f32 %v4360_v18, %v5450_v53  ;;  %v5563_v34 = vpop.f32.mrb[14].mxu1  ;;  %v5565_v11 = vpop.f32.mrb[15].mxu0 }
 0x378   : > { %v3420_v49 = vadd.f32 %v3316_v20, %v3316_v20  ;;  %v5559_v26 = vadd.f32 %v3103_v30, %v2987_v5  ;;  %v3086_v47 = vadd.f32 %v5267_v24, %v5440_v3  ;;  %v3465_v57 = vadd.f32 %v3450_v8, %v3449_v37  ;;  %v5572_v44 = vpop.f32.mrb[15].mxu1  ;;  %v3227_v20 = vpop.permute.xlu0 %3226 }
 0x379   : > { %v3306_v7 = vsel %vm3305_vm11, %v5443_v36, %v3304_v32  ;;  %vm3319_vm2 = vcmp.eq.f32.partialorder %v5511_v12, inf  ;;  %4363 = vrsqrt.f32 %v5554_v61  ;;  %v3327_v3 = vsel %vm3326_vm15, %v5450_v53, %v3325_v19  ;;  %v3231_v32 = vpop.permute.xlu1 %3230 }
 0x37a   : > { %v3436_v18 = vsub.f32 %v5431_v38, %v3420_v49  ;;  %v3309_v24 = vsel %vm3307_vm10, %v3308_v22, %v3306_v7  ;;  %v3322_v30 = vand.u32 2147483648, %v5511_v12  ;;  %v3330_v8 = vsel %vm3328_vm1, %v3329_v40, %v3327_v3 }
 0x37b   : > { %v3419_v62 = vadd.f32 %v3309_v24, %v3309_v24  ;;  %vm3152_vm3 = vcmp.lt.f32.partialorder %v2987_v5, 36.0  ;;  %vm3151_vm4 = vcmp.lt.f32.partialorder %v2986_v52, 36.0  ;;  %vm3137_vm5 = vcmp.gt.s32.totalorder %v5214_v43, %v5284_v31 }
 0x37c   : > { %v3452_v38 = vmul.f32 %v3436_v18, %v5427_v14  ;;  %v3422_v23 = vadd.f32 %v3330_v8, %v3330_v8  ;;  %vm3167_vm6 = vmand %vm3135_vm13, %vm3151_vm4  ;;  %v3102_v36 = vmax.f32 %v3086_v47, 0.0  ;;  %v2973_v22 = vadd.f32 %v5455_v58, %v5304_v56 }
 0x37d   : > { %v4362_v37 = vpop.eup %4361  ;;  %v3435_v53 = vsub.f32 %v5445_v45, %v3419_v62  ;;  %v5593_v40 = vsel %vm3167_vm6, %v5394_v10, 0.0  ;;  %vm3138_vm7 = vcmp.gt.s32.totalorder %v5214_v43, %v5281_v4  ;;  %v3089_v14 = vadd.f32 %v5462_v16, %v5308_v29  ;;  %vm3168_vm8 = vmand %vm3136_vm0, %vm3152_vm3 }
 0x37e   : > { %v2972_v28 = vadd.f32 %v5288_v6, %v5464_v15  ;;  %v3438_v49 = vsub.f32 %v5452_v46, %v3422_v23  ;;  %v3318_v56 = vmul.f32 %v4362_v37, %v5511_v12  ;;  %v3496_v45 = vadd.f32 %v3495_v33, %v5593_v40 }
 0x37f   : > { %v5604_v58 = vmul.f32 %v3102_v36, %v2986_v52  ;;  %v3451_v10 = vmul.f32 %v3435_v53, %v5459_v2  ;;  %v5611_v29 = vadd.f32 %v3102_v36, %v2986_v52  ;;  %v2989_v6 = vmax.f32 %v2973_v22, 0.0 }
 0x380   : > { %v3105_v16 = vmax.f32 %v3089_v14, 0.0  ;;  %v3454_v15 = vmul.f32 %v3438_v49, %v5526_v60  ;;  %v3320_v46 = vsel %vm3319_vm2, %v5511_v12, %v3318_v56  ;;  %vm3321_vm9 = vcmp.eq.f32.partialorder %v5511_v12, 0.0 }
 0x381   : > { %4365 = vrsqrt.f32 %v5604_v58  ;;  %v5620_v2 = vmul.f32 %v3227_v20, %v5898_v25  ;;  %v5623_v39 = vmul.f32 %v3231_v32, %v5898_v25  ;;  %v3466_v5 = vadd.f32 %v3465_v57, %v3451_v10 }
 0x382   : > { %v3323_v33 = vsel %vm3321_vm9, %v3322_v30, %v3320_v46  ;;  %v3264_v19 = vsel %vm3168_vm8, %v5397_v51, 0.0  ;;  %v5626_v60 = vmul.f32 %v3105_v16, %v2989_v6  ;;  %v5628_v47 = vadd.f32 %v3105_v16, %v2989_v6 }
 0x383   : > { %v3421_v52 = vadd.f32 %v3323_v33, %v3323_v33  ;;  %vm3139_vm11 = vcmp.gt.s32.totalorder %v5214_v43, %v5294_v55  ;;  %v4364_v12 = vpop.eup %4363  ;;  %v3467_v7 = vadd.f32 %v3466_v5, %v3452_v38  ;;  %v2988_v18 = vmax.f32 %v2972_v28, 0.0  ;;  %v5922_v38 = vld [vmem:[#allocation12_spill] sm:$0xff] }
 0x384   : > { %v3497_v24 = vadd.f32 %v3496_v45, %v3264_v19  ;;  %v3088_v3 = vadd.f32 %v5301_v48, %v5470_v1  ;;  %v3339_v30 = vmul.f32 %v4364_v12, %v5554_v61  ;;  %vm3340_vm14 = vcmp.eq.f32.partialorder %v5554_v61, inf  ;;  %v5921_v1 = vld [vmem:[#allocation11_spill] sm:$0xff] }
 0x385   : > { %v3437_v57 = vsub.f32 %v5520_v59, %v3421_v52  ;;  %4367 = vrsqrt.f32 %v5626_v60  ;;  %vm3342_vm10 = vcmp.eq.f32.partialorder %v5554_v61, 0.0  ;;  %v3343_v51 = vand.u32 2147483648, %v5554_v61 }
 0x386   : > { %vm3154_vm13 = vcmp.lt.f32.partialorder %v2989_v6, 36.0  ;;  %vm3153_vm15 = vcmp.lt.f32.partialorder %v2988_v18, 36.0  ;;  %v3341_v8 = vsel %vm3340_vm14, %v5554_v61, %v3339_v30  ;;  %v3104_v48 = vmax.f32 %v3088_v3, 0.0  ;;  %v5923_v61 = vld [vmem:[#allocation14_spill] sm:$0xff] }
 0x387   : > { %v3453_v62 = vmul.f32 %v3437_v57, %v5509_v21  ;;  %vm3169_vm0 = vmand %vm3137_vm5, %vm3153_vm15  ;;  %v2975_v59 = vadd.f32 %v5486_v13, %v5921_v1  ;;  %vm3140_vm1 = vcmp.gt.s32.totalorder %v5214_v43, %v5922_v38  ;;  %v3344_v23 = vsel %vm3342_vm10, %v3343_v51, %v3341_v8  ;;  %v5929_v30 = vld [vmem:[#allocation22_spill] sm:$0xff] }
 0x388   : > { %v5650_v36 = vsel %vm3169_vm0, %v5401_v0, 0.0  ;;  %v3091_v21 = vadd.f32 %v5498_v9, %v5334_v27  ;;  %v2974_v22 = vadd.f32 %v5923_v61, %v5500_v54  ;;  %v3424_v31 = vadd.f32 %v3344_v23, %v3344_v23  ;;  %vm3170_vm2 = vmand %vm3138_vm7, %vm3154_vm13 }
 0x389   : > { %v3468_v37 = vadd.f32 %v3467_v7, %v3453_v62  ;;  %v3498_v13 = vadd.f32 %v3497_v24, %v5650_v36  ;;  %v5660_v53 = vmul.f32 %v3104_v48, %v2988_v18  ;;  %v5662_v14 = vadd.f32 %v3104_v48, %v2988_v18  ;;  %v5926_v7 = vld [vmem:[#allocation18_spill] sm:$0xff]  ;;  %v5927_v18 = vld [vmem:[#allocation24_spill] sm:$0xff] }
 0x38a   : > { %v2991_v0 = vmax.f32 %v2975_v59, 0.0  ;;  %v3107_v28 = vmax.f32 %v3091_v21, 0.0  ;;  %v2990_v20 = vmax.f32 %v2974_v22, 0.0  ;;  %v3440_v27 = vsub.f32 %v5559_v26, %v3424_v31  ;;  %v5924_v26 = vld [vmem:[#allocation9_spill] sm:$0xff]  ;;  %v5930_v21 = vld [vmem:[#allocation23_spill] sm:$0xff]  ;;  %v5932_v31 = vld [vmem:[#allocation26_spill] sm:$0xff] }
 0x38b   : > { %v4366_v32 = vpop.eup %4365  ;;  %vm3333_vm3 = vcmp.eq.f32.partialorder %v5604_v58, inf  ;;  %v3469_v9 = vadd.f32 %v3468_v37, %v3454_v15  ;;  %4369 = vrsqrt.f32 %v5660_v53  ;;  %vm3335_vm4 = vcmp.eq.f32.partialorder %v5604_v58, 0.0 }
 0x38c   : > { %v3332_v4 = vmul.f32 %v4366_v32, %v5604_v58  ;;  %v3336_v54 = vand.u32 2147483648, %v5604_v58  ;;  %v3266_v49 = vsel %vm3170_vm2, %v5404_v35, 0.0  ;;  %v3456_v56 = vmul.f32 %v3440_v27, %v3264_v19  ;;  %v5925_v35 = vld [vmem:[#allocation16_spill] sm:$0xff]  ;;  %v5934_v27 = vld [vmem:[#allocation17_spill] sm:$0xff] }
 0x38d   : > { %v5671_v45 = vmul.f32 %v3107_v28, %v2991_v0  ;;  %v5673_v10 = vadd.f32 %v3107_v28, %v2991_v0  ;;  %vm3155_vm5 = vcmp.lt.f32.partialorder %v2990_v20, 36.0  ;;  %vm3141_vm6 = vcmp.gt.s32.totalorder %v5214_v43, %v5924_v26 }
 0x38e   : > { %v3334_v6 = vsel %vm3333_vm3, %v5604_v58, %v3332_v4  ;;  %vm3354_vm7 = vcmp.eq.f32.partialorder %v5626_v60, inf  ;;  %vm3171_vm8 = vmand %vm3139_vm11, %vm3155_vm5  ;;  %v3499_v16 = vadd.f32 %v3498_v13, %v3266_v49  ;;  %v3090_v15 = vadd.f32 %v5925_v35, %v5515_v42  ;;  %v5933_v13 = vld [vmem:[#allocation15_spill] sm:$0xff] }
 0x38f   : > { %v4368_v46 = vpop.eup %4367  ;;  %v3337_v5 = vsel %vm3335_vm4, %v3336_v54, %v3334_v6  ;;  %vm3356_vm9 = vcmp.eq.f32.partialorder %v5626_v60, 0.0  ;;  %vm3156_vm14 = vcmp.lt.f32.partialorder %v2991_v0, 36.0  ;;  %4371 = vrsqrt.f32 %v5671_v45 }
 0x390   : > { %v3423_v33 = vadd.f32 %v3337_v5, %v3337_v5  ;;  %v3353_v58 = vmul.f32 %v4368_v46, %v5626_v60  ;;  %v3357_v52 = vand.u32 2147483648, %v5626_v60  ;;  %v5689_v19 = vsel %vm3171_vm8, %v5413_v17, 0.0  ;;  %vm3172_vm10 = vmand %vm3140_vm1, %vm3156_vm14  ;;  %v5928_v17 = vld [vmem:[#allocation25_spill] sm:$0xff] }
 0x391   : > { %v3500_v55 = vadd.f32 %v3499_v16, %v5689_v19  ;;  %v3106_v12 = vmax.f32 %v3090_v15, 0.0  ;;  %v2977_v42 = vadd.f32 %v5529_v63, %v5346_v50  ;;  %v3093_v24 = vadd.f32 %v5927_v18, %v5926_v7  ;;  %v5935_v15 = vld [vmem:[#allocation20_spill] sm:$0xff]  ;;  %v5936_v46 = vld [vmem:[#allocation21_spill] sm:$0xff] }
 0x392   : > { %v3439_v3 = vsub.f32 %v5611_v29, %v3423_v33  ;;  %v3355_v57 = vsel %vm3354_vm7, %v5626_v60, %v3353_v58  ;;  %vm3347_vm11 = vcmp.eq.f32.partialorder %v5660_v53, inf  ;;  %v2976_v51 = vadd.f32 %v5929_v30, %v5928_v17  ;;  %v5931_v60 = vld [vmem:[#allocation13_spill] sm:$0xff]  ;;  %v5937_v33 = vld [vmem:[#allocation19_spill] sm:$0xff]  ;;  %v5939_v7 = vld [vmem:[#allocation8_spill] sm:$0xff] }
 0x393   : > { %v3358_v50 = vsel %vm3356_vm9, %v3357_v52, %v3355_v57  ;;  %v5708_v63 = vmul.f32 %v3106_v12, %v2990_v20  ;;  %v5710_v62 = vadd.f32 %v3106_v12, %v2990_v20  ;;  %v2993_v29 = vmax.f32 %v2977_v42, 0.0  ;;  %v3235_v52 = vpop.permute.xlu0 %3234  ;;  %v5938_v12 = vld [vmem:[#allocation10_spill] sm:$0xff] }
 0x394   : > { %v3455_v8 = vmul.f32 %v3439_v3, %v5593_v40  ;;  %v3426_v48 = vadd.f32 %v3358_v50, %v3358_v50  ;;  %v3109_v1 = vmax.f32 %v3093_v24, 0.0  ;;  %v2992_v59 = vmax.f32 %v2976_v51, 0.0 }
 0x395   : > { %v4370_v23 = vpop.eup %4369  ;;  %vm3349_vm13 = vcmp.eq.f32.partialorder %v5660_v53, 0.0  ;;  %v3350_v38 = vand.u32 2147483648, %v5660_v53  ;;  %v3268_v61 = vsel %vm3172_vm10, %v5930_v21, 0.0  ;;  %4373 = vrsqrt.f32 %v5708_v63 }
 0x396   : > { %vm3142_vm15 = vcmp.gt.s32.totalorder %v5214_v43, %v5931_v60  ;;  %v3470_v22 = vadd.f32 %v3469_v9, %v3455_v8  ;;  %v3442_v37 = vsub.f32 %v5628_v47, %v3426_v48  ;;  %v3346_v40 = vmul.f32 %v4370_v23, %v5660_v53 }
 0x397   : > { %v3092_v0 = vadd.f32 %v5933_v13, %v5932_v31  ;;  %v5723_v28 = vmul.f32 %v3109_v1, %v2993_v29  ;;  %v5725_v20 = vadd.f32 %v3109_v1, %v2993_v29  ;;  %vm3157_vm0 = vcmp.lt.f32.partialorder %v2992_v59, 36.0 }
 0x398   : > { %v3501_v32 = vadd.f32 %v3500_v55, %v3268_v61  ;;  %vm3143_vm1 = vcmp.gt.s32.totalorder %v5214_v43, %v5934_v27  ;;  %v3458_v4 = vmul.f32 %v3442_v37, %v3266_v49  ;;  %v3348_v9 = vsel %vm3347_vm11, %v5660_v53, %v3346_v40  ;;  %vm3173_vm3 = vmand %vm3141_vm6, %vm3157_vm0 }
 0x399   : > { %v3471_v47 = vadd.f32 %v3470_v22, %v3456_v56  ;;  %vm3368_vm2 = vcmp.eq.f32.partialorder %v5671_v45, inf  ;;  %v4372_v54 = vpop.eup %4371  ;;  %v3351_v6 = vsel %vm3349_vm13, %v3350_v38, %v3348_v9  ;;  %vm3370_vm4 = vcmp.eq.f32.partialorder %v5671_v45, 0.0 }
 0x39a   : > { %v3371_v16 = vand.u32 2147483648, %v5671_v45  ;;  %4375 = vrsqrt.f32 %v5723_v28  ;;  %v3425_v49 = vadd.f32 %v3351_v6, %v3351_v6  ;;  %v3367_v35 = vmul.f32 %v4372_v54, %v5671_v45 }
 0x39b   : > { %vm3158_vm5 = vcmp.lt.f32.partialorder %v2993_v29, 36.0  ;;  %v5743_v56 = vsel %vm3173_vm3, %v5620_v2, 0.0  ;;  %vm3144_vm6 = vcmp.gt.s32.totalorder %v5214_v43, %v5935_v15  ;;  %v3108_v53 = vmax.f32 %v3092_v0, 0.0 }
 0x39c   : > { %v3502_v26 = vadd.f32 %v3501_v32, %v5743_v56  ;;  %v2979_v5 = vadd.f32 %v5556_v41, %v5936_v46  ;;  %v3095_v58 = vadd.f32 %v5563_v34, %v5937_v33  ;;  %v3441_v55 = vsub.f32 %v5662_v14, %v3425_v49  ;;  %vm3174_vm9 = vmand %vm3142_vm15, %vm3158_vm5 }
 0x39d   : > { %v3369_v2 = vsel %vm3368_vm2, %v5671_v45, %v3367_v35  ;;  %v2978_v42 = vadd.f32 %v5938_v12, %v5565_v11  ;;  %v3094_v18 = vadd.f32 %v5939_v7, %v5572_v44  ;;  %v5762_v41 = vmul.f32 %v3108_v53, %v2992_v59  ;;  %v3239_v11 = vpop.permute.xlu1 %3238 }
 0x39e   : > { %v3372_v24 = vsel %vm3370_vm4, %v3371_v16, %v3369_v2  ;;  %v5764_v3 = vadd.f32 %v3108_v53, %v2992_v59  ;;  %v2995_v34 = vmax.f32 %v2979_v5, 0.0  ;;  %v3457_v14 = vmul.f32 %v3441_v55, %v5650_v36 }
 0x39f   : > { %v3428_v57 = vadd.f32 %v3372_v24, %v3372_v24  ;;  %v3111_v17 = vmax.f32 %v3095_v58, 0.0  ;;  %v2994_v30 = vmax.f32 %v2978_v42, 0.0  ;;  %v4374_v51 = vpop.eup %4373  ;;  %v3255_v50 = vmul.f32 %v3235_v52, %v5898_v25 }
 0x3a0   : > { %vm3361_vm7 = vcmp.eq.f32.partialorder %v5708_v63, inf  ;;  %vm3363_vm8 = vcmp.eq.f32.partialorder %v5708_v63, 0.0  ;;  %4377 = vrsqrt.f32 %v5762_v41  ;;  %v3472_v44 = vadd.f32 %v3471_v47, %v3457_v14 }
 0x3a1   : > { %v3444_v45 = vsub.f32 %v5673_v10, %v3428_v57  ;;  %v3360_v8 = vmul.f32 %v4374_v51, %v5708_v63  ;;  %v3364_v36 = vand.u32 2147483648, %v5708_v63  ;;  %v3288_v48 = vmul.f32 %v3111_v17, %v2995_v34 }
 0x3a2   : > { %v5778_v1 = vadd.f32 %v3111_v17, %v2995_v34  ;;  %vm3159_vm14 = vcmp.lt.f32.partialorder %v2994_v30, 36.0  ;;  %v3110_v59 = vmax.f32 %v3094_v18, 0.0  ;;  %v3473_v21 = vadd.f32 %v3472_v44, %v3458_v4 }
 0x3a3   : > { %v3460_v23 = vmul.f32 %v3444_v45, %v3268_v61  ;;  %v3362_v38 = vsel %vm3361_vm7, %v5708_v63, %v3360_v8  ;;  %vm3160_vm11 = vcmp.lt.f32.partialorder %v2995_v34, 36.0  ;;  %vm3175_vm10 = vmand %vm3143_vm1, %vm3159_vm14  ;;  %v3256_v29 = vmul.f32 %v3239_v11, %v5898_v25 }
 0x3a4   : > { %v4376_v10 = vpop.eup %4375  ;;  %v3365_v60 = vsel %vm3363_vm8, %v3364_v36, %v3362_v38  ;;  %v3270_v22 = vsel %vm3174_vm9, %v5623_v39, 0.0  ;;  %4379 = vrsqrt.f32 %v3288_v48  ;;  %vm3382_vm13 = vcmp.eq.f32.partialorder %v5723_v28, inf  ;;  %vm3176_vm15 = vmand %vm3144_vm6, %vm3160_vm11 }
 0x3a5   : > { %v3427_v37 = vadd.f32 %v3365_v60, %v3365_v60  ;;  %v3381_v61 = vmul.f32 %v4376_v10, %v5723_v28  ;;  %v3287_v40 = vmul.f32 %v3110_v59, %v2994_v30  ;;  %v3385_v31 = vand.u32 2147483648, %v5723_v28 }
 0x3a6   : > { %v3415_v13 = vadd.f32 %v3110_v59, %v2994_v30  ;;  %v3271_v25 = vsel %vm3175_vm10, %v3255_v50, 0.0  ;;  %v3503_v0 = vadd.f32 %v3502_v26, %v3270_v22  ;;  %vm3384_vm0 = vcmp.eq.f32.partialorder %v5723_v28, 0.0 }
 0x3a7   : > { %v3443_v63 = vsub.f32 %v5710_v62, %v3427_v37  ;;  %v3383_v39 = vsel %vm3382_vm13, %v5723_v28, %v3381_v61  ;;  %4381 = vrsqrt.f32 %v3287_v40  ;;  %v3272_v47 = vsel %vm3176_vm15, %v3256_v29, 0.0 }
 0x3a8   : > { %v3386_v32 = vsel %vm3384_vm0, %v3385_v31, %v3383_v39  ;;  %v3504_v27 = vadd.f32 %v3503_v0, %v3271_v25  ;;  %vm3375_vm1 = vcmp.eq.f32.partialorder %v5762_v41, inf  ;;  %v3378_v62 = vand.u32 2147483648, %v5762_v41 }
 0x3a9   : > { %v3459_v4 = vmul.f32 %v3443_v63, %v5689_v19  ;;  %v3430_v9 = vadd.f32 %v3386_v32, %v3386_v32  ;;  %vm3377_vm2 = vcmp.eq.f32.partialorder %v5762_v41, 0.0  ;;  %vm3396_vm3 = vcmp.eq.f32.partialorder %v3288_v48, inf }
 0x3aa   : > { %v4378_v54 = vpop.eup %4377  ;;  %v3505_v6 = vadd.f32 %v3504_v27, %v3272_v47  ;;  %v3399_v5 = vand.u32 2147483648, %v3288_v48  ;;  %vm3398_vm4 = vcmp.eq.f32.partialorder %v3288_v48, 0.0  ;;  %vm3389_vm5 = vcmp.eq.f32.partialorder %v3287_v40, inf }
 0x3ab   : > { %v3474_v16 = vadd.f32 %v3473_v21, %v3459_v4  ;;  %v3446_v43 = vsub.f32 %v5725_v20, %v3430_v9  ;;  %v3374_v49 = vmul.f32 %v4378_v54, %v5762_v41  ;;  %v3392_v42 = vand.u32 2147483648, %v3287_v40 }
 0x3ac   : > { %3506 = vadd.xlane.f32.xlu1 %v3505_v6  ;;  %vm3391_vm6 = vcmp.eq.f32.partialorder %v3287_v40, 0.0 }
 0x3ad   : > { %v3462_v28 = vmul.f32 %v3446_v43, %v3270_v22  ;;  %v3376_v35 = vsel %vm3375_vm1, %v5762_v41, %v3374_v49  ;;  %v3475_v19 = vadd.f32 %v3474_v16, %v3460_v23  ;;  %v5940_v22 = vstv %s4539_s10 }
 0x3ae   : > { %v4380_v15 = vpop.eup %4379  ;;  %v3379_v26 = vsel %vm3377_vm2, %v3378_v62, %v3376_v35 }
 0x3af   : > { %v3429_v53 = vadd.f32 %v3379_v26, %v3379_v26  ;;  %v3395_v46 = vmul.f32 %v4380_v15, %v3288_v48 }
 0x3b1   : > { %v4382_v20 = vpop.eup %4381  ;;  %v3445_v33 = vsub.f32 %v5764_v3, %v3429_v53  ;;  %v3397_v58 = vsel %vm3396_vm3, %v3288_v48, %v3395_v46 }
 0x3b2   : > { %v3400_v52 = vsel %vm3398_vm4, %v3399_v5, %v3397_v58  ;;  %v3388_v55 = vmul.f32 %v4382_v20, %v3287_v40 }
 0x3b3   : > { %v3461_v2 = vmul.f32 %v3445_v33, %v5743_v56  ;;  %v3432_v12 = vadd.f32 %v3400_v52, %v3400_v52 }
 0x3b4   : > { %v3390_v7 = vsel %vm3389_vm5, %v3287_v40, %v3388_v55 }
 0x3b5   : > { %v3448_v18 = vsub.f32 %v5778_v1, %v3432_v12  ;;  %v3393_v24 = vsel %vm3391_vm6, %v3392_v42, %v3390_v7  ;;  %v3476_v41 = vadd.f32 %v3475_v19, %v3461_v2 }
 0x3b6   : > { %v3431_v34 = vadd.f32 %v3393_v24, %v3393_v24 }
 0x3b7   : > { %v3464_v14 = vmul.f32 %v3448_v18, %v3272_v47  ;;  %v3477_v57 = vadd.f32 %v3476_v41, %v3462_v28 }
 0x3b8   : > { %v3447_v17 = vsub.f32 %v3415_v13, %v3431_v34 }
 0x3ba   : > { %v3463_v3 = vmul.f32 %v3447_v17, %v3271_v25 }
 0x3bc   : > { %v3478_v30 = vadd.f32 %v3477_v57, %v3463_v3 }
 0x3be   : > { %v3479_v51 = vadd.f32 %v3478_v30, %v3464_v14 }
 0x3c0   : > { %3480 = vadd.xlane.f32.xlu0 %v3479_v51 }
 0x439   : > { %v3507_v50 = vpop.xlane.xlu1 %3506 }
 0x43a   : > { %v3508_v11 = vrot.slane %v3507_v50, 4 }
 0x43c   : > { %v3509_v56 = vadd.f32 %v3508_v11, %v3507_v50 }
 0x43e   : > { %v3510_v44 = vrot.slane %v3509_v56, 2 }
 0x440   : > { %v3511_v48 = vadd.f32 %v3510_v44, %v3509_v56 }
 0x442   : > { %v3512_v23 = vrot.slane %v3511_v48, 1 }
 0x444   : > { %v3513_v10 = vadd.f32 %v3512_v23, %v3511_v48 }
 0x44d   : > { %v3481_v45 = vpop.xlane.xlu0 %3480 }
 0x44e   : > { %v3482_v8 = vrot.slane %v3481_v45, 4 }
 0x450   : > { %v3483_v36 = vadd.f32 %v3482_v8, %v3481_v45 }
 0x452   : > { %v3484_v1 = vrot.slane %v3483_v36, 2 }
 0x454   : > { %v3485_v59 = vadd.f32 %v3484_v1, %v3483_v36 }
 0x456   : > { %v3486_v38 = vrot.slane %v3485_v59, 1 }
 0x458   : > { %v3487_v21 = vadd.f32 %v3486_v38, %v3485_v59 }
 0x45a   : > { %4293 = vpush %v3487_v21 }
 0x45b   : > { %4295 = vpush %v3513_v10 }
 0x48b   : > { %s4294_s14 = spop %4293 }
 0x48c   : > { %s4296_s15 = spop %4295  ;;  %v3489_v40 = vstv %s4294_s14 }
 0x48d   : > { %v3515_v29 = vstv %s4296_s15  ;;  %v3517_v31 = vadd.f32 %v3489_v40, %v3489_v40 }
 0x48e   : > { %v3518_v60 = vadd.f32 %v3515_v29, %v3515_v29 }
 0x490   : > { %v3519_v37 = vadd.f32 %v3518_v60, %v5940_v22 }
 0x492   : > { %v3520_v61 = vadd.f32 1e-06, %v3519_v37 }
 0x494   : > { %4383 = vrcp.f32 %v3520_v61 }
 0x49e   : > { %v4384_v13 = vpop.eup %4383 }
 0x49f   : > { %v3522_v25 = vmul.f32 %v4384_v13, %v3517_v31 }
 0x4a1   : > { %3523 = vst.msk [vmem:[%s4463_s23 + $0x4] sm:$0x1] %vm409_vm12, %v3522_v25 }
 0x4a2 PF: > { %s19_s17 = sadd.s32 1, %s4405_s17  }
 0x4a3   : > { %p16_p10 = scmp.ge.s32.totalorder %s19_s17, 4  }
 0x4a5   :  { %18 = sbr.rel (!%p16_p10) target bundleno = 16 (0x10), region = 65 }

</bundles_post_ra>
